<compile_context>
chip_gen: v7x
topology: tpu7x:2x2x1
jax: 0.10.0
libtpu: 0.0.40
codegen_flags: <defaults>
</compile_context>

<pallas_src>
import functools

import jax
import jax.numpy as jnp
from jax.experimental import pallas as pl
from jax.experimental.pallas import tpu as pltpu


# -----------------------------------------------------------------------------
# Kernel: one image per grid step.
#   x_ref  : (M, Cin)  f32   flattened spatial rows, channels on lanes
#   w1_ref : (Cin, P)  bf16  (BN1 scale folded in)
#   w2_ref : (9, P, P) bf16  3x3 taps flattened kh*3+kw (BN2 scale folded in)
#   w3_ref : (P, Cout) bf16  (BN3 scale folded in)
#   b*_ref : (1, C)    f32   folded BN biases
#   out_ref: (M, Cout) f32
#   pad_ref: (M + 2*PADR, P) f32 scratch — h1 with a zero halo of PADR rows.
# -----------------------------------------------------------------------------
def _bottleneck_kernel(x_ref, w1_ref, w2_ref, w3_ref, b1_ref, b2_ref, b3_ref,
                       out_ref, pad_ref, *, W, PADR):
    M, _ = x_ref.shape
    P = w1_ref.shape[1]

    x = x_ref[...]                               # f32, reused for the residual
    xb = x.astype(jnp.bfloat16)

    # ---- conv1 (1x1) + bn1 + relu -------------------------------------------
    h1 = jnp.dot(xb, w1_ref[...], preferred_element_type=jnp.float32)
    h1 = jnp.maximum(h1 + b1_ref[...], 0.0)      # (M, P) f32

    # ---- conv2 (3x3, stride=1, pad=1) + bn2 + relu --------------------------
    # In the flattened (M, P) layout a spatial shift (dh, dw) is a row shift by
    # dh*W + dw.  Store h1 once between zero halos; each tap is then a plain
    # contiguous sublane-slice read (no strided 4-D windows, no reshapes).
    pad_ref[0:PADR, :] = jnp.zeros((PADR, P), jnp.float32)             # top halo
    pad_ref[PADR + M:PADR + M + PADR, :] = jnp.zeros((PADR, P), jnp.float32)
    pad_ref[PADR:PADR + M, :] = h1

    row = jax.lax.broadcasted_iota(jnp.int32, (M, 1), 0)
    w_idx = row % W
    not_left = w_idx != 0            # tap valid when dw == -1
    not_right = w_idx != (W - 1)     # tap valid when dw == +1

    acc = jnp.zeros((M, P), jnp.float32)
    tap = 0
    for dh in (-1, 0, 1):
        for dw in (-1, 0, 1):
            start = PADR + dh * W + dw                    # static offset
            win = pad_ref[start:start + M, :]             # (M, P) f32
            if dw == -1:
                win = jnp.where(not_left, win, 0.0)
            elif dw == 1:
                win = jnp.where(not_right, win, 0.0)
            acc = acc + jnp.dot(win.astype(jnp.bfloat16), w2_ref[tap],
                                preferred_element_type=jnp.float32)
            tap += 1
    h2 = jnp.maximum(acc + b2_ref[...], 0.0)              # (M, P) f32

    # ---- conv3 (1x1) + bn3 + identity residual + relu -----------------------
    h3 = jnp.dot(h2.astype(jnp.bfloat16), w3_ref[...],
                 preferred_element_type=jnp.float32)
    out = jnp.maximum(h3 + b3_ref[...] + x, 0.0)
    out_ref[...] = out.astype(out_ref.dtype)


def bottleneck_pallas(x_nhwc, w1, w2, w3, b1, b2, b3):
    N, H, W, Cin = x_nhwc.shape
    P = w1.shape[1]
    Cout = w3.shape[1]
    assert Cout == Cin, "identity residual requires inplanes == planes * 4"
    M = H * W
    PADR = -(-(W + 1) // 8) * 8          # halo rows >= W+1, sublane-aligned

    x_flat = x_nhwc.reshape(N, M, Cin)
    kernel = functools.partial(_bottleneck_kernel, W=W, PADR=PADR)

    flops = 2 * N * M * (Cin * P + 9 * P * P + P * Cout)
    bytes_accessed = (N * M * Cin * 4 + N * M * Cout * 4
                      + (w1.size + w2.size + w3.size) * 2
                      + (b1.size + b2.size + b3.size) * 4)

    out_flat = pl.pallas_call(
        kernel,
        out_shape=jax.ShapeDtypeStruct((N, M, Cout), jnp.float32),
        grid=(N,),
        in_specs=[
            pl.BlockSpec((None, M, Cin), lambda n: (n, 0, 0)),   # x, per image
            pl.BlockSpec((Cin, P), lambda n: (0, 0)),            # w1 (resident)
            pl.BlockSpec((9, P, P), lambda n: (0, 0, 0)),        # w2 (resident)
            pl.BlockSpec((P, Cout), lambda n: (0, 0)),           # w3 (resident)
            pl.BlockSpec((1, P), lambda n: (0, 0)),              # b1
            pl.BlockSpec((1, P), lambda n: (0, 0)),              # b2
            pl.BlockSpec((1, Cout), lambda n: (0, 0)),           # b3
        ],
        out_specs=pl.BlockSpec((None, M, Cout), lambda n: (n, 0, 0)),
        scratch_shapes=[pltpu.VMEM((M + 2 * PADR, P), jnp.float32)],
        compiler_params=pltpu.CompilerParams(
            dimension_semantics=("parallel",),      # megacore on v7x
            vmem_limit_bytes=32 * 1024 * 1024),
        cost_estimate=pl.CostEstimate(flops=flops, transcendentals=0,
                                      bytes_accessed=bytes_accessed),
    )(x_flat, w1, w2, w3, b1, b2, b3)
    return out_flat.reshape(N, H, W, Cout)


# -----------------------------------------------------------------------------
# Plain-JAX glue: parameters, BN folding, NCHW <-> NHWC plumbing, reference.
# -----------------------------------------------------------------------------
def make_params(key, inplanes, planes):
    """Raw module parameters: HWIO-style conv weights + BN (gamma,beta,mean,var)."""
    k1, k2, k3 = jax.random.split(key, 3)
    w1 = jax.random.normal(k1, (inplanes, planes), jnp.float32) * (2.0 / inplanes) ** 0.5
    w2 = jax.random.normal(k2, (3, 3, planes, planes), jnp.float32) * (2.0 / (9 * planes)) ** 0.5
    w3 = jax.random.normal(k3, (planes, planes * 4), jnp.float32) * (2.0 / planes) ** 0.5

    def bn_params(c, off):
        i = jnp.arange(c, dtype=jnp.float32)
        gamma = 1.0 + 0.05 * jnp.cos(i + off)
        beta = 0.02 * jnp.sin(i + off)
        mean = 0.01 * jnp.cos(0.5 * i + off)
        var = 1.0 + 0.1 * (jnp.sin(0.3 * i + off) ** 2)
        return gamma, beta, mean, var

    return dict(w1=w1, w2=w2, w3=w3,
                bn1=bn_params(planes, 0.0),
                bn2=bn_params(planes, 1.0),
                bn3=bn_params(planes * 4, 2.0))


def _fold_bn(w, bn, eps=1e-5):
    gamma, beta, mean, var = bn
    scale = gamma / jnp.sqrt(var + eps)            # per output channel
    bias = beta - mean * scale
    return (w * scale).astype(jnp.bfloat16), bias[None, :].astype(jnp.float32)


def prepare_kernel_params(params):
    """Fold inference-BN scale into the conv weights; cast matmul weights to bf16."""
    w1, b1 = _fold_bn(params["w1"], params["bn1"])
    w2, b2 = _fold_bn(params["w2"], params["bn2"])
    w3, b3 = _fold_bn(params["w3"], params["bn3"])
    P = w2.shape[-1]
    w2 = w2.reshape(9, P, P)                       # taps flattened (kh*3 + kw)
    return w1, w2, w3, b1, b2, b3


def bottleneck_forward(x_nchw, params):
    # Wrapper accepts PyTorch-convention NCHW; kernel runs channels-last.
    # TODO(synk): production callers should pass NHWC directly to avoid the two
    # boundary transposes (a full extra HBM round trip for a mem-bound block).
    kp = prepare_kernel_params(params)
    x_nhwc = jnp.transpose(x_nchw, (0, 2, 3, 1))
    out_nhwc = bottleneck_pallas(x_nhwc, *kp)
    return jnp.transpose(out_nhwc, (0, 3, 1, 2))


def bottleneck_reference(x_nchw, params, eps=1e-5):
    """Plain-JAX f32 reference (lax convs + inference-mode BN)."""
    def bn(h, bnp):
        gamma, beta, mean, var = bnp
        return (h - mean) * (gamma / jnp.sqrt(var + eps)) + beta

    x = jnp.transpose(x_nchw, (0, 2, 3, 1))
    dn = ("NHWC", "HWIO", "NHWC")
    conv = functools.partial(jax.lax.conv_general_dilated, dimension_numbers=dn)
    h = jnp.maximum(bn(conv(x, params["w1"][None, None], (1, 1), "VALID"), params["bn1"]), 0.0)
    h = jnp.maximum(bn(conv(h, params["w2"], (1, 1), ((1, 1), (1, 1))), params["bn2"]), 0.0)
    h = bn(conv(h, params["w3"][None, None], (1, 1), "VALID"), params["bn3"])
    out = jnp.maximum(h + x, 0.0)
    return jnp.transpose(out, (0, 3, 1, 2))


if __name__ == "__main__":
    # Small shapes: inplanes = planes * expansion so downsample=None is valid.
    N, planes, H, W = 2, 4, 16, 16
    inplanes = planes * 4  # 16

    key = jax.random.PRNGKey(0)
    kx, kp = jax.random.split(key)
    x = jax.random.normal(kx, (N, inplanes, H, W), jnp.float32)   # NCHW input
    params = make_params(kp, inplanes, planes)

    out = jax.block_until_ready(bottleneck_forward(x, params))
    ref = bottleneck_reference(x, params)

    assert out.shape == (N, inplanes, H, W)
    assert bool(jnp.all(jnp.isfinite(out)))
    assert bool(jnp.allclose(out, ref, rtol=5e-2, atol=5e-2)), "mismatch vs reference"

    print("KERNEL_OK")
</pallas_src>

<mosaic_0001>
module attributes {stable_mosaic.version = 11 : i64} {
  func.func @_bottleneck_kernel(%arg0: i32, %arg1: memref<1x256x16xf32, #tpu.memory_space<vmem>>, %arg2: memref<16x4xbf16, #tpu.memory_space<vmem>>, %arg3: memref<9x4x4xbf16, #tpu.memory_space<vmem>>, %arg4: memref<4x16xbf16, #tpu.memory_space<vmem>>, %arg5: memref<1x4xf32, #tpu.memory_space<vmem>>, %arg6: memref<1x4xf32, #tpu.memory_space<vmem>>, %arg7: memref<1x16xf32, #tpu.memory_space<vmem>>, %arg8: memref<1x256x16xf32, #tpu.memory_space<vmem>>, %arg9: memref<304x4xf32, #tpu.memory_space<vmem>>) attributes {dimension_semantics = [#tpu.dimension_semantics<parallel>], iteration_bounds = array<i64: 2>, scalar_prefetch = 0 : i64, scratch_operands = 1 : i64, tpu.core_type = #tpu.core_type<tc>, window_params = [{transform_indices = @transform_0, window_bounds = array<i64: 1, 256, 16>}, {pipeline_mode = #tpu.pipeline_mode<synchronous>, transform_indices = @transform_1, window_bounds = array<i64: 16, 4>}, {pipeline_mode = #tpu.pipeline_mode<synchronous>, transform_indices = @transform_2, window_bounds = array<i64: 9, 4, 4>}, {pipeline_mode = #tpu.pipeline_mode<synchronous>, transform_indices = @transform_3, window_bounds = array<i64: 4, 16>}, {pipeline_mode = #tpu.pipeline_mode<synchronous>, transform_indices = @transform_4, window_bounds = array<i64: 1, 4>}, {pipeline_mode = #tpu.pipeline_mode<synchronous>, transform_indices = @transform_5, window_bounds = array<i64: 1, 4>}, {pipeline_mode = #tpu.pipeline_mode<synchronous>, transform_indices = @transform_6, window_bounds = array<i64: 1, 16>}, {transform_indices = @transform_7, window_bounds = array<i64: 1, 256, 16>}]} {
    %c0 = arith.constant 0 : index
    %c0_0 = arith.constant 0 : index
    %c0_1 = arith.constant 0 : index
    %0 = vector.load %arg1[%c0, %c0_0, %c0_1] : memref<1x256x16xf32, #tpu.memory_space<vmem>>, vector<1x256x16xf32>
    %1 = vector.shape_cast %0 : vector<1x256x16xf32> to vector<256x16xf32>
    %2 = arith.truncf %1 : vector<256x16xf32> to vector<256x16xbf16>
    %c0_2 = arith.constant 0 : index
    %c0_3 = arith.constant 0 : index
    %3 = vector.load %arg2[%c0_2, %c0_3] : memref<16x4xbf16, #tpu.memory_space<vmem>>, vector<16x4xbf16>
    %cst = arith.constant dense<0.000000e+00> : vector<256x4xf32>
    %4 = tpu.matmul %2, %3, %cst {dimension_numbers = #tpu.dot_dimension_numbers<[1], [0], [0], [1], [0, 0, 1, 1], [], []>} : vector<256x16xbf16>, vector<16x4xbf16>, vector<256x4xf32> -> vector<256x4xf32>
    %c0_4 = arith.constant 0 : index
    %c0_5 = arith.constant 0 : index
    %5 = vector.load %arg5[%c0_4, %c0_5] : memref<1x4xf32, #tpu.memory_space<vmem>>, vector<1x4xf32>
    %6 = vector.broadcast %5 : vector<1x4xf32> to vector<256x4xf32>
    %7 = arith.addf %4, %6 : vector<256x4xf32>
    %cst_6 = arith.constant 0.000000e+00 : f32
    %8 = vector.broadcast %cst_6 : f32 to vector<256x4xf32>
    %9 = arith.maximumf %7, %8 : vector<256x4xf32>
    %cst_7 = arith.constant 0.000000e+00 : f32
    %10 = vector.broadcast %cst_7 : f32 to vector<24x4xf32>
    %c0_8 = arith.constant 0 : index
    %c0_9 = arith.constant 0 : index
    %11 = vector.load %arg9[%c0_8, %c0_9] : memref<304x4xf32, #tpu.memory_space<vmem>>, vector<24x4xf32>
    tpu.vector_store %arg9[%c0_8, %c0_9], %10 {strides = array<i32>} : memref<304x4xf32, #tpu.memory_space<vmem>>, vector<24x4xf32>,
    %cst_10 = arith.constant 0.000000e+00 : f32
    %12 = vector.broadcast %cst_10 : f32 to vector<24x4xf32>
    %c280 = arith.constant 280 : index
    %c0_11 = arith.constant 0 : index
    %13 = vector.load %arg9[%c280, %c0_11] : memref<304x4xf32, #tpu.memory_space<vmem>>, vector<24x4xf32>
    tpu.vector_store %arg9[%c280, %c0_11], %12 {strides = array<i32>} : memref<304x4xf32, #tpu.memory_space<vmem>>, vector<24x4xf32>,
    %c24 = arith.constant 24 : index
    %c0_12 = arith.constant 0 : index
    %14 = vector.load %arg9[%c24, %c0_12] : memref<304x4xf32, #tpu.memory_space<vmem>>, vector<256x4xf32>
    tpu.vector_store %arg9[%c24, %c0_12], %9 {strides = array<i32>} : memref<304x4xf32, #tpu.memory_space<vmem>>, vector<256x4xf32>,
    %15 = tpu.iota {dimensions = array<i32: 0>} : vector<256x1xi32>
    %c16_i32 = arith.constant 16 : i32
    %c0_i32 = arith.constant 0 : i32
    %16 = arith.cmpi eq, %c16_i32, %c0_i32 : i32
    %c1_i32 = arith.constant 1 : i32
    %17 = arith.select %16, %c1_i32, %c16_i32 : i32
    %18 = vector.broadcast %17 : i32 to vector<256x1xi32>
    %19 = arith.remsi %15, %18 : vector<256x1xi32>
    %c0_i32_13 = arith.constant 0 : i32
    %20 = vector.broadcast %c0_i32_13 : i32 to vector<256x1xi32>
    %21 = arith.cmpi ne, %19, %20 : vector<256x1xi32>
    %c0_i32_14 = arith.constant 0 : i32
    %22 = vector.broadcast %c0_i32_14 : i32 to vector<256x1xi32>
    %23 = arith.cmpi slt, %19, %22 : vector<256x1xi32>
    %c0_i32_15 = arith.constant 0 : i32
    %24 = arith.cmpi slt, %17, %c0_i32_15 : i32
    %25 = vector.broadcast %24 : i1 to vector<256x1xi1>
    %26 = vector.broadcast %25 : vector<256x1xi1> to vector<256x1xi1>
    %27 = arith.xori %23, %26 : vector<256x1xi1>
    %28 = arith.andi %27, %21 : vector<256x1xi1>
    %29 = vector.broadcast %17 : i32 to vector<256x1xi32>
    %30 = arith.addi %19, %29 : vector<256x1xi32>
    %31 = arith.select %28, %30, %19 : vector<256x1xi1>, vector<256x1xi32>
    %c0_i32_16 = arith.constant 0 : i32
    %32 = vector.broadcast %c0_i32_16 : i32 to vector<256x1xi32>
    %33 = arith.cmpi ne, %31, %32 : vector<256x1xi32>
    %c15_i32 = arith.constant 15 : i32
    %34 = vector.broadcast %c15_i32 : i32 to vector<256x1xi32>
    %35 = arith.cmpi ne, %31, %34 : vector<256x1xi32>
    %cst_17 = arith.constant 0.000000e+00 : f32
    %36 = vector.broadcast %cst_17 : f32 to vector<256x4xf32>
    %c7 = arith.constant 7 : index
    %c0_18 = arith.constant 0 : index
    %37 = vector.load %arg9[%c7, %c0_18] : memref<304x4xf32, #tpu.memory_space<vmem>>, vector<256x4xf32>
    %cst_19 = arith.constant 0.000000e+00 : f32
    %38 = vector.shape_cast %33 : vector<256x1xi1> to vector<256x1xi1>
    %39 = vector.broadcast %38 : vector<256x1xi1> to vector<256x4xi1>
    %40 = vector.broadcast %cst_19 : f32 to vector<256x4xf32>
    %41 = arith.select %39, %37, %40 : vector<256x4xi1>, vector<256x4xf32>
    %42 = arith.truncf %41 : vector<256x4xf32> to vector<256x4xbf16>
    %c0_20 = arith.constant 0 : index
    %c0_21 = arith.constant 0 : index
    %c0_22 = arith.constant 0 : index
    %43 = vector.load %arg3[%c0_20, %c0_21, %c0_22] : memref<9x4x4xbf16, #tpu.memory_space<vmem>>, vector<1x4x4xbf16>
    %44 = vector.shape_cast %43 : vector<1x4x4xbf16> to vector<4x4xbf16>
    %cst_23 = arith.constant dense<0.000000e+00> : vector<256x4xf32>
    %45 = tpu.matmul %42, %44, %cst_23 {dimension_numbers = #tpu.dot_dimension_numbers<[1], [0], [0], [1], [0, 0, 1, 1], [], []>} : vector<256x4xbf16>, vector<4x4xbf16>, vector<256x4xf32> -> vector<256x4xf32>
    %46 = arith.addf %36, %45 : vector<256x4xf32>
    %c8 = arith.constant 8 : index
    %c0_24 = arith.constant 0 : index
    %47 = vector.load %arg9[%c8, %c0_24] : memref<304x4xf32, #tpu.memory_space<vmem>>, vector<256x4xf32>
    %48 = arith.truncf %47 : vector<256x4xf32> to vector<256x4xbf16>
    %c1 = arith.constant 1 : index
    %c0_25 = arith.constant 0 : index
    %c0_26 = arith.constant 0 : index
    %49 = vector.load %arg3[%c1, %c0_25, %c0_26] : memref<9x4x4xbf16, #tpu.memory_space<vmem>>, vector<1x4x4xbf16>
    %50 = vector.shape_cast %49 : vector<1x4x4xbf16> to vector<4x4xbf16>
    %cst_27 = arith.constant dense<0.000000e+00> : vector<256x4xf32>
    %51 = tpu.matmul %48, %50, %cst_27 {dimension_numbers = #tpu.dot_dimension_numbers<[1], [0], [0], [1], [0, 0, 1, 1], [], []>} : vector<256x4xbf16>, vector<4x4xbf16>, vector<256x4xf32> -> vector<256x4xf32>
    %52 = arith.addf %46, %51 : vector<256x4xf32>
    %c9 = arith.constant 9 : index
    %c0_28 = arith.constant 0 : index
    %53 = vector.load %arg9[%c9, %c0_28] : memref<304x4xf32, #tpu.memory_space<vmem>>, vector<256x4xf32>
    %cst_29 = arith.constant 0.000000e+00 : f32
    %54 = vector.shape_cast %35 : vector<256x1xi1> to vector<256x1xi1>
    %55 = vector.broadcast %54 : vector<256x1xi1> to vector<256x4xi1>
    %56 = vector.broadcast %cst_29 : f32 to vector<256x4xf32>
    %57 = arith.select %55, %53, %56 : vector<256x4xi1>, vector<256x4xf32>
    %58 = arith.truncf %57 : vector<256x4xf32> to vector<256x4xbf16>
    %c2 = arith.constant 2 : index
    %c0_30 = arith.constant 0 : index
    %c0_31 = arith.constant 0 : index
    %59 = vector.load %arg3[%c2, %c0_30, %c0_31] : memref<9x4x4xbf16, #tpu.memory_space<vmem>>, vector<1x4x4xbf16>
    %60 = vector.shape_cast %59 : vector<1x4x4xbf16> to vector<4x4xbf16>
    %cst_32 = arith.constant dense<0.000000e+00> : vector<256x4xf32>
    %61 = tpu.matmul %58, %60, %cst_32 {dimension_numbers = #tpu.dot_dimension_numbers<[1], [0], [0], [1], [0, 0, 1, 1], [], []>} : vector<256x4xbf16>, vector<4x4xbf16>, vector<256x4xf32> -> vector<256x4xf32>
    %62 = arith.addf %52, %61 : vector<256x4xf32>
    %c23 = arith.constant 23 : index
    %c0_33 = arith.constant 0 : index
    %63 = vector.load %arg9[%c23, %c0_33] : memref<304x4xf32, #tpu.memory_space<vmem>>, vector<256x4xf32>
    %cst_34 = arith.constant 0.000000e+00 : f32
    %64 = vector.shape_cast %33 : vector<256x1xi1> to vector<256x1xi1>
    %65 = vector.broadcast %64 : vector<256x1xi1> to vector<256x4xi1>
    %66 = vector.broadcast %cst_34 : f32 to vector<256x4xf32>
    %67 = arith.select %65, %63, %66 : vector<256x4xi1>, vector<256x4xf32>
    %68 = arith.truncf %67 : vector<256x4xf32> to vector<256x4xbf16>
    %c3 = arith.constant 3 : index
    %c0_35 = arith.constant 0 : index
    %c0_36 = arith.constant 0 : index
    %69 = vector.load %arg3[%c3, %c0_35, %c0_36] : memref<9x4x4xbf16, #tpu.memory_space<vmem>>, vector<1x4x4xbf16>
    %70 = vector.shape_cast %69 : vector<1x4x4xbf16> to vector<4x4xbf16>
    %cst_37 = arith.constant dense<0.000000e+00> : vector<256x4xf32>
    %71 = tpu.matmul %68, %70, %cst_37 {dimension_numbers = #tpu.dot_dimension_numbers<[1], [0], [0], [1], [0, 0, 1, 1], [], []>} : vector<256x4xbf16>, vector<4x4xbf16>, vector<256x4xf32> -> vector<256x4xf32>
    %72 = arith.addf %62, %71 : vector<256x4xf32>
    %c24_38 = arith.constant 24 : index
    %c0_39 = arith.constant 0 : index
    %73 = vector.load %arg9[%c24_38, %c0_39] : memref<304x4xf32, #tpu.memory_space<vmem>>, vector<256x4xf32>
    %74 = arith.truncf %73 : vector<256x4xf32> to vector<256x4xbf16>
    %c4 = arith.constant 4 : index
    %c0_40 = arith.constant 0 : index
    %c0_41 = arith.constant 0 : index
    %75 = vector.load %arg3[%c4, %c0_40, %c0_41] : memref<9x4x4xbf16, #tpu.memory_space<vmem>>, vector<1x4x4xbf16>
    %76 = vector.shape_cast %75 : vector<1x4x4xbf16> to vector<4x4xbf16>
    %cst_42 = arith.constant dense<0.000000e+00> : vector<256x4xf32>
    %77 = tpu.matmul %74, %76, %cst_42 {dimension_numbers = #tpu.dot_dimension_numbers<[1], [0], [0], [1], [0, 0, 1, 1], [], []>} : vector<256x4xbf16>, vector<4x4xbf16>, vector<256x4xf32> -> vector<256x4xf32>
    %78 = arith.addf %72, %77 : vector<256x4xf32>
    %c25 = arith.constant 25 : index
    %c0_43 = arith.constant 0 : index
    %79 = vector.load %arg9[%c25, %c0_43] : memref<304x4xf32, #tpu.memory_space<vmem>>, vector<256x4xf32>
    %cst_44 = arith.constant 0.000000e+00 : f32
    %80 = vector.shape_cast %35 : vector<256x1xi1> to vector<256x1xi1>
    %81 = vector.broadcast %80 : vector<256x1xi1> to vector<256x4xi1>
    %82 = vector.broadcast %cst_44 : f32 to vector<256x4xf32>
    %83 = arith.select %81, %79, %82 : vector<256x4xi1>, vector<256x4xf32>
    %84 = arith.truncf %83 : vector<256x4xf32> to vector<256x4xbf16>
    %c5 = arith.constant 5 : index
    %c0_45 = arith.constant 0 : index
    %c0_46 = arith.constant 0 : index
    %85 = vector.load %arg3[%c5, %c0_45, %c0_46] : memref<9x4x4xbf16, #tpu.memory_space<vmem>>, vector<1x4x4xbf16>
    %86 = vector.shape_cast %85 : vector<1x4x4xbf16> to vector<4x4xbf16>
    %cst_47 = arith.constant dense<0.000000e+00> : vector<256x4xf32>
    %87 = tpu.matmul %84, %86, %cst_47 {dimension_numbers = #tpu.dot_dimension_numbers<[1], [0], [0], [1], [0, 0, 1, 1], [], []>} : vector<256x4xbf16>, vector<4x4xbf16>, vector<256x4xf32> -> vector<256x4xf32>
    %88 = arith.addf %78, %87 : vector<256x4xf32>
    %c39 = arith.constant 39 : index
    %c0_48 = arith.constant 0 : index
    %89 = vector.load %arg9[%c39, %c0_48] : memref<304x4xf32, #tpu.memory_space<vmem>>, vector<256x4xf32>
    %cst_49 = arith.constant 0.000000e+00 : f32
    %90 = vector.shape_cast %33 : vector<256x1xi1> to vector<256x1xi1>
    %91 = vector.broadcast %90 : vector<256x1xi1> to vector<256x4xi1>
    %92 = vector.broadcast %cst_49 : f32 to vector<256x4xf32>
    %93 = arith.select %91, %89, %92 : vector<256x4xi1>, vector<256x4xf32>
    %94 = arith.truncf %93 : vector<256x4xf32> to vector<256x4xbf16>
    %c6 = arith.constant 6 : index
    %c0_50 = arith.constant 0 : index
    %c0_51 = arith.constant 0 : index
    %95 = vector.load %arg3[%c6, %c0_50, %c0_51] : memref<9x4x4xbf16, #tpu.memory_space<vmem>>, vector<1x4x4xbf16>
    %96 = vector.shape_cast %95 : vector<1x4x4xbf16> to vector<4x4xbf16>
    %cst_52 = arith.constant dense<0.000000e+00> : vector<256x4xf32>
    %97 = tpu.matmul %94, %96, %cst_52 {dimension_numbers = #tpu.dot_dimension_numbers<[1], [0], [0], [1], [0, 0, 1, 1], [], []>} : vector<256x4xbf16>, vector<4x4xbf16>, vector<256x4xf32> -> vector<256x4xf32>
    %98 = arith.addf %88, %97 : vector<256x4xf32>
    %c40 = arith.constant 40 : index
    %c0_53 = arith.constant 0 : index
    %99 = vector.load %arg9[%c40, %c0_53] : memref<304x4xf32, #tpu.memory_space<vmem>>, vector<256x4xf32>
    %100 = arith.truncf %99 : vector<256x4xf32> to vector<256x4xbf16>
    %c7_54 = arith.constant 7 : index
    %c0_55 = arith.constant 0 : index
    %c0_56 = arith.constant 0 : index
    %101 = vector.load %arg3[%c7_54, %c0_55, %c0_56] : memref<9x4x4xbf16, #tpu.memory_space<vmem>>, vector<1x4x4xbf16>
    %102 = vector.shape_cast %101 : vector<1x4x4xbf16> to vector<4x4xbf16>
    %cst_57 = arith.constant dense<0.000000e+00> : vector<256x4xf32>
    %103 = tpu.matmul %100, %102, %cst_57 {dimension_numbers = #tpu.dot_dimension_numbers<[1], [0], [0], [1], [0, 0, 1, 1], [], []>} : vector<256x4xbf16>, vector<4x4xbf16>, vector<256x4xf32> -> vector<256x4xf32>
    %104 = arith.addf %98, %103 : vector<256x4xf32>
    %c41 = arith.constant 41 : index
    %c0_58 = arith.constant 0 : index
    %105 = vector.load %arg9[%c41, %c0_58] : memref<304x4xf32, #tpu.memory_space<vmem>>, vector<256x4xf32>
    %cst_59 = arith.constant 0.000000e+00 : f32
    %106 = vector.shape_cast %35 : vector<256x1xi1> to vector<256x1xi1>
    %107 = vector.broadcast %106 : vector<256x1xi1> to vector<256x4xi1>
    %108 = vector.broadcast %cst_59 : f32 to vector<256x4xf32>
    %109 = arith.select %107, %105, %108 : vector<256x4xi1>, vector<256x4xf32>
    %110 = arith.truncf %109 : vector<256x4xf32> to vector<256x4xbf16>
    %c8_60 = arith.constant 8 : index
    %c0_61 = arith.constant 0 : index
    %c0_62 = arith.constant 0 : index
    %111 = vector.load %arg3[%c8_60, %c0_61, %c0_62] : memref<9x4x4xbf16, #tpu.memory_space<vmem>>, vector<1x4x4xbf16>
    %112 = vector.shape_cast %111 : vector<1x4x4xbf16> to vector<4x4xbf16>
    %cst_63 = arith.constant dense<0.000000e+00> : vector<256x4xf32>
    %113 = tpu.matmul %110, %112, %cst_63 {dimension_numbers = #tpu.dot_dimension_numbers<[1], [0], [0], [1], [0, 0, 1, 1], [], []>} : vector<256x4xbf16>, vector<4x4xbf16>, vector<256x4xf32> -> vector<256x4xf32>
    %114 = arith.addf %104, %113 : vector<256x4xf32>
    %c0_64 = arith.constant 0 : index
    %c0_65 = arith.constant 0 : index
    %115 = vector.load %arg6[%c0_64, %c0_65] : memref<1x4xf32, #tpu.memory_space<vmem>>, vector<1x4xf32>
    %116 = vector.broadcast %115 : vector<1x4xf32> to vector<256x4xf32>
    %117 = arith.addf %114, %116 : vector<256x4xf32>
    %cst_66 = arith.constant 0.000000e+00 : f32
    %118 = vector.broadcast %cst_66 : f32 to vector<256x4xf32>
    %119 = arith.maximumf %117, %118 : vector<256x4xf32>
    %120 = arith.truncf %119 : vector<256x4xf32> to vector<256x4xbf16>
    %c0_67 = arith.constant 0 : index
    %c0_68 = arith.constant 0 : index
    %121 = vector.load %arg4[%c0_67, %c0_68] : memref<4x16xbf16, #tpu.memory_space<vmem>>, vector<4x16xbf16>
    %cst_69 = arith.constant dense<0.000000e+00> : vector<256x16xf32>
    %122 = tpu.matmul %120, %121, %cst_69 {dimension_numbers = #tpu.dot_dimension_numbers<[1], [0], [0], [1], [0, 0, 1, 1], [], []>} : vector<256x4xbf16>, vector<4x16xbf16>, vector<256x16xf32> -> vector<256x16xf32>
    %c0_70 = arith.constant 0 : index
    %c0_71 = arith.constant 0 : index
    %123 = vector.load %arg7[%c0_70, %c0_71] : memref<1x16xf32, #tpu.memory_space<vmem>>, vector<1x16xf32>
    %124 = vector.broadcast %123 : vector<1x16xf32> to vector<256x16xf32>
    %125 = arith.addf %122, %124 : vector<256x16xf32>
    %126 = arith.addf %125, %1 : vector<256x16xf32>
    %cst_72 = arith.constant 0.000000e+00 : f32
    %127 = vector.broadcast %cst_72 : f32 to vector<256x16xf32>
    %128 = arith.maximumf %126, %127 : vector<256x16xf32>
    %c0_73 = arith.constant 0 : index
    %c0_74 = arith.constant 0 : index
    %c0_75 = arith.constant 0 : index
    %129 = vector.load %arg8[%c0_73, %c0_74, %c0_75] : memref<1x256x16xf32, #tpu.memory_space<vmem>>, vector<1x256x16xf32>
    %130 = vector.shape_cast %129 : vector<1x256x16xf32> to vector<256x16xf32>
    %131 = vector.shape_cast %128 : vector<256x16xf32> to vector<1x256x16xf32>
    tpu.vector_store %arg8[%c0_73, %c0_74, %c0_75], %131 {strides = array<i32>} : memref<1x256x16xf32, #tpu.memory_space<vmem>>, vector<1x256x16xf32>,
    return
  }
  func.func @transform_0(%arg0: i32) -> (i32, i32, i32) {
    %c0_i32 = arith.constant 0 : i32
    %c0_i32_0 = arith.constant 0 : i32
    %c0_i32_1 = arith.constant 0 : i32
    return %arg0, %c0_i32, %c0_i32_0 : i32, i32, i32
  }
  func.func @transform_1(%arg0: i32) -> (i32, i32) {
    %c0_i32 = arith.constant 0 : i32
    %c0_i32_0 = arith.constant 0 : i32
    %c0_i32_1 = arith.constant 0 : i32
    return %c0_i32, %c0_i32_0 : i32, i32
  }
  func.func @transform_2(%arg0: i32) -> (i32, i32, i32) {
    %c0_i32 = arith.constant 0 : i32
    %c0_i32_0 = arith.constant 0 : i32
    %c0_i32_1 = arith.constant 0 : i32
    %c0_i32_2 = arith.constant 0 : i32
    return %c0_i32, %c0_i32_0, %c0_i32_1 : i32, i32, i32
  }
  func.func @transform_3(%arg0: i32) -> (i32, i32) {
    %c0_i32 = arith.constant 0 : i32
    %c0_i32_0 = arith.constant 0 : i32
    %c0_i32_1 = arith.constant 0 : i32
    return %c0_i32, %c0_i32_0 : i32, i32
  }
  func.func @transform_4(%arg0: i32) -> (i32, i32) {
    %c0_i32 = arith.constant 0 : i32
    %c0_i32_0 = arith.constant 0 : i32
    %c0_i32_1 = arith.constant 0 : i32
    return %c0_i32, %c0_i32_0 : i32, i32
  }
  func.func @transform_5(%arg0: i32) -> (i32, i32) {
    %c0_i32 = arith.constant 0 : i32
    %c0_i32_0 = arith.constant 0 : i32
    %c0_i32_1 = arith.constant 0 : i32
    return %c0_i32, %c0_i32_0 : i32, i32
  }
  func.func @transform_6(%arg0: i32) -> (i32, i32) {
    %c0_i32 = arith.constant 0 : i32
    %c0_i32_0 = arith.constant 0 : i32
    %c0_i32_1 = arith.constant 0 : i32
    return %c0_i32, %c0_i32_0 : i32, i32
  }
  func.func @transform_7(%arg0: i32) -> (i32, i32, i32) {
    %c0_i32 = arith.constant 0 : i32
    %c0_i32_0 = arith.constant 0 : i32
    %c0_i32_1 = arith.constant 0 : i32
    return %arg0, %c0_i32, %c0_i32_0 : i32, i32, i32
  }
}

</mosaic_0001>

<bundles_post_ra>
// kernel: tpu_custom_call.1
= control target key start
LH: loop header
LB: loop body
LE: loop exit
PB: predicated region body
PF: predicated region fallthrough
CT: control target
= control target key end

     0   :  { %s5587_s24 = smov 0   ;;  %s7032_s0 = inlined_call_operand.vmem [shape: f32[2,256,16], index: 0, kind: input, shape index: {}]   ;;  %s7033_s1 = inlined_call_operand.vmem [shape: bf16[16,4], index: 1, kind: input, shape index: {}]   ;;  %s7034_s2 = inlined_call_operand.vmem [shape: bf16[9,4,4], index: 2, kind: input, shape index: {}]   ;;  %s7035_s3 = inlined_call_operand.vmem [shape: bf16[4,16], index: 3, kind: input, shape index: {}]   ;;  %s7036_s4 = inlined_call_operand.vmem [shape: f32[1,4], index: 4, kind: input, shape index: {}]   ;;  %s7037_s5 = inlined_call_operand.vmem [shape: f32[1,4], index: 5, kind: input, shape index: {}]   ;;  %s7038_s6 = inlined_call_operand.vmem [shape: f32[1,16], index: 6, kind: input, shape index: {}]   ;;  %s7039_s7 = inlined_call_operand.vmem [shape: f32[2,256,16], index: 7, kind: output, shape index: {}]  }
   0x1 LB: > { %s4465_s25 = sadd.s32 4294967295, %s5544_s24   ;;  %p4469_p0 = scmp.ge.s32.totalorder %s5544_s24, 1  ;;  %s5544_s24 = sphi %s5587_s24, %s17_s24  }
   0x2   : > { %p237_p1 = scmp.lt.s32.totalorder %s5544_s24, 3 }
   0x4   : > { %p238_p2 = pnand %p4469_p0, %p237_p1 }
   0x6   : > { %241 = sbr.rel (%p238_p2) target bundleno = 1084 (0x43c), region = 48 }
   0xd   : > { %v5505_v0 = vld [vmem:[%s7033_s1] sm:$0xff]   ;;  %p269_p3 = scmp.lt.s32.totalorder %s4465_s25, 1  ;;  %vm7042_vm0 = vcmask 130048   ;;  %vm7064_vm1 = vcmask 31744   ;;  %v5546_v49 = vmov 0.0   ;;  %vm7055_vm2 = vcmask 1041408  }
   0xe   : > { %4853 = vmatprep.subr.bf16.mxu0 %v5505_v0  ;;  %587 = vst.msk [vmem:[#allocation2 + $0x8] sm:$0xff] %vm7064_vm1, %v5546_v49  ;;  %588 = vst.msk [vmem:[#allocation2 + $0x10] sm:$0xff] %vm7064_vm1, %v5546_v49  ;;  %v4492_v50 = vld [vmem:[%s7034_s2 + $0x2] sm:$0x3]  ;;  %v5671_v55 = vld [vmem:[%s7034_s2 + $0x6] sm:$0x3] }
   0xf   : > { %s7526_s25 = smov (!%p269_p3, %s4465_s25), 1  ;;  %4854 = vmatpush3.bf16.msra.mxu0 %v5505_v0  ;;  %586 = vst.msk [vmem:[#allocation2] sm:$0xff] %vm7064_vm1, %v5546_v49  ;;  %589 = vst.msk [vmem:[#allocation2 + $0x118] sm:$0xff] %vm7064_vm1, %v5546_v49  ;;  %v1350_v51 = vsel %vm7055_vm2, %v4492_v50, 0  ;;  %5489 = vmatprep.subr.msk.bf16.mxu1 %vm7055_vm2, %v5671_v55  ;;  %v5677_v56 = vsel %vm7055_vm2, %v5671_v55, 0 }
  0x10   : > { %s4664_s28 = sshll.u32 %s7526_s25, 8  ;;  %590 = vst.msk [vmem:[#allocation2 + $0x120] sm:$0xff] %vm7064_vm1, %v5546_v49  ;;  %591 = vst.msk [vmem:[#allocation2 + $0x128] sm:$0xff] %vm7064_vm1, %v5546_v49  ;;  %5485 = vmatprep.subr.msk.bf16.mxu0 %vm7055_vm2, %v4492_v50  ;;  %5228 = vmatpush3.bf16.msra.mxu1 %v5677_v56  ;;  %v5683_v57 = vld [vmem:[%s7034_s2 + $0x8] sm:$0x3] }
  0x11   : > { %s5606_s8 = scalar_lea.vmem %s7032_s0, %s4664_s28  ;;  %7129 = vst [vmem:[#allocation3_spill] sm:$0xff] %v5677_v56  ;;  %5490 = vmatprep.subr.msk.bf16.mxu1 %vm7055_vm2, %v5683_v57  ;;  %v1249_v58 = vld [vmem:[%s7034_s2] sm:$0x3]  ;;  %s6903_s18 = scalar_lea.vmem %s7039_s7, %s4664_s28 }
  0x12   : > { %v280_v1 = vld [vmem:[%s5606_s8] sm:$0xff]  ;;  %v281_v2 = vld [vmem:[%s5606_s8 + $0x8] sm:$0xff]  ;;  %v282_v3 = vld [vmem:[%s5606_s8 + $0x10] sm:$0xff] }
  0x13   : > { %v312_v4 = vpack.c.bf16 %v281_v2, %v280_v1  ;;  %v283_v5 = vld [vmem:[%s5606_s8 + $0x18] sm:$0xff]  ;;  %v284_v6 = vld [vmem:[%s5606_s8 + $0x20] sm:$0xff]  ;;  %v285_v7 = vld [vmem:[%s5606_s8 + $0x28] sm:$0xff]  ;;  %v624_v1 = vlaneseq }
  0x14   : > { %v313_v8 = vpack.c.bf16 %v283_v5, %v282_v3  ;;  %v314_v9 = vpack.c.bf16 %v285_v7, %v284_v6  ;;  %v286_v10 = vld [vmem:[%s5606_s8 + $0x30] sm:$0xff]  ;;  %v287_v11 = vld [vmem:[%s5606_s8 + $0x38] sm:$0xff]  ;;  %v288_v12 = vld [vmem:[%s5606_s8 + $0x40] sm:$0xff] }
  0x15   : > { %4855 = vmatprep.mubr.msk.bf16.mxu0 %vm7042_vm0, %v312_v4  ;;  %v289_v13 = vld [vmem:[%s5606_s8 + $0x48] sm:$0xff]  ;;  %v315_v14 = vpack.c.bf16 %v287_v11, %v286_v10  ;;  %v290_v16 = vld [vmem:[%s5606_s8 + $0x50] sm:$0xff]  ;;  %v291_v17 = vld [vmem:[%s5606_s8 + $0x58] sm:$0xff] }
  0x16   : > { %4856 = vmatmul.mubr.msk.bf16.vlgmr.msra.gmra.mrb[0].mxu0 %vm7042_vm0, %v313_v8  ;;  %v316_v15 = vpack.c.bf16 %v289_v13, %v288_v12  ;;  %v292_v18 = vld [vmem:[%s5606_s8 + $0x60] sm:$0xff]  ;;  %v293_v19 = vld [vmem:[%s5606_s8 + $0x68] sm:$0xff]  ;;  %v317_v20 = vpack.c.bf16 %v291_v17, %v290_v16  ;;  %v294_v22 = vld [vmem:[%s5606_s8 + $0x70] sm:$0xff] }
  0x17   : > { %4859 = vmatprep.mubr.msk.bf16.mxu0 %vm7042_vm0, %v314_v9  ;;  %v318_v21 = vpack.c.bf16 %v293_v19, %v292_v18  ;;  %v295_v23 = vld [vmem:[%s5606_s8 + $0x78] sm:$0xff]  ;;  %v296_v24 = vld [vmem:[%s5606_s8 + $0x80] sm:$0xff]  ;;  %v297_v25 = vld [vmem:[%s5606_s8 + $0x88] sm:$0xff]  ;;  %4888 = vmatpush3.bf16.msra.mxu0 %v1350_v51  ;;  %v5702_v9 = vshrl.u32 %v624_v1, 7 }
  0x18   : > { %v319_v26 = vpack.c.bf16 %v295_v23, %v294_v22  ;;  %v320_v27 = vpack.c.bf16 %v297_v25, %v296_v24  ;;  %v298_v28 = vld [vmem:[%s5606_s8 + $0x90] sm:$0xff]  ;;  %v299_v29 = vld [vmem:[%s5606_s8 + $0x98] sm:$0xff]  ;;  %v300_v30 = vld [vmem:[%s5606_s8 + $0xa0] sm:$0xff]  ;;  %5486 = vmatprep.subr.msk.bf16.mxu0 %vm7055_vm2, %v1249_v58 }
  0x19   : > { %v301_v31 = vld [vmem:[%s5606_s8 + $0xa8] sm:$0xff]  ;;  %v321_v32 = vpack.c.bf16 %v299_v29, %v298_v28  ;;  %v302_v34 = vld [vmem:[%s5606_s8 + $0xb0] sm:$0xff]  ;;  %v303_v35 = vld [vmem:[%s5606_s8 + $0xb8] sm:$0xff]  ;;  %7130 = vst [vmem:[#allocation4_spill] sm:$0xff] %v5702_v9  ;;  %v661_v11 = vand.u32 15, %v5702_v9  ;;  %v627_v19 = vadd.s32 16, %v5702_v9 }
  0x1a   : > { %v322_v33 = vpack.c.bf16 %v301_v31, %v300_v30  ;;  %v304_v36 = vld [vmem:[%s5606_s8 + $0xc0] sm:$0xff]  ;;  %v305_v37 = vld [vmem:[%s5606_s8 + $0xc8] sm:$0xff]  ;;  %v323_v38 = vpack.c.bf16 %v303_v35, %v302_v34  ;;  %v306_v40 = vld [vmem:[%s5606_s8 + $0xd0] sm:$0xff]  ;;  %v629_v28 = vadd.s32 32, %v5702_v9 }
  0x1b   : > { %v324_v39 = vpack.c.bf16 %v305_v37, %v304_v36  ;;  %v307_v41 = vld [vmem:[%s5606_s8 + $0xd8] sm:$0xff]  ;;  %v308_v42 = vld [vmem:[%s5606_s8 + $0xe0] sm:$0xff]  ;;  %v309_v43 = vld [vmem:[%s5606_s8 + $0xe8] sm:$0xff]  ;;  %vm5712_vm3 = vcmp.ne.s32.totalorder %v661_v11, 0  ;;  %v675_v30 = vand.u32 15, %v627_v19  ;;  %v1562_v37 = vsel %vm7055_vm2, %v1249_v58, 0 }
  0x1c   : > { %v325_v44 = vpack.c.bf16 %v307_v41, %v306_v40  ;;  %v326_v45 = vpack.c.bf16 %v309_v43, %v308_v42  ;;  %v310_v46 = vld [vmem:[%s5606_s8 + $0xf0] sm:$0xff]  ;;  %v311_v47 = vld [vmem:[%s5606_s8 + $0xf8] sm:$0xff]  ;;  %v1250_v52 = vld [vmem:[#allocation2 + $0x8] sm:$0xff]  ;;  %v631_v42 = vadd.s32 48, %v5702_v9 }
  0x1d   : > { %v327_v48 = vpack.c.bf16 %v311_v47, %v310_v46  ;;  %v1251_v53 = vld [vmem:[#allocation2 + $0x10] sm:$0xff]  ;;  %v5694_v59 = vld [vmem:[%s7036_s4] ss:$0 sm:$0xff]  ;;  %v5743_v43 = vld [vmem:[%s7034_s2 + $0x4] sm:$0x3]  ;;  %v689_v46 = vand.u32 15, %v629_v28 }
  0x1e   : > { %4860 = vmatmul.mubr.msk.bf16.gmra.mrb[4].mxu0 %vm7042_vm0, %v315_v14  ;;  %v1282_v54 = vpack.c.bf16 %v1251_v53, %v1250_v52  ;;  %vm5756_vm4 = vcmp.ne.s32.totalorder %v675_v30, 0 }
  0x1f   : > { %4863 = vmatprep.mubr.msk.bf16.mxu0 %vm7042_vm0, %v316_v15  ;;  %vm5776_vm5 = vcmp.ne.s32.totalorder %v689_v46, 0  ;;  %v637_v46 = vadd.s32 96, %v5702_v9 }
  0x26   : > { %4864 = vmatmul.mubr.msk.bf16.gmra.mrb[8].mxu0 %vm7042_vm0, %v317_v20 }
  0x27   : > { %4867 = vmatprep.mubr.msk.bf16.mxu0 %vm7042_vm0, %v318_v21 }
  0x2e   : > { %4868 = vmatmul.mubr.msk.bf16.gmra.mrb[12].mxu0 %vm7042_vm0, %v319_v26 }
  0x2f   : > { %4871 = vmatprep.mubr.msk.bf16.mxu0 %vm7042_vm0, %v320_v27 }
  0x36   : > { %4872 = vmatmul.mubr.msk.bf16.gmra.mrb[16].mxu0 %vm7042_vm0, %v321_v32 }
  0x37   : > { %4875 = vmatprep.mubr.msk.bf16.mxu0 %vm7042_vm0, %v322_v33 }
  0x3e   : > { %4876 = vmatmul.mubr.msk.bf16.gmra.mrb[20].mxu0 %vm7042_vm0, %v323_v38 }
  0x3f   : > { %4879 = vmatprep.mubr.msk.bf16.mxu0 %vm7042_vm0, %v324_v39 }
  0x46   : > { %4880 = vmatmul.mubr.msk.bf16.gmra.mrb[24].mxu0 %vm7042_vm0, %v325_v44 }
  0x47   : > { %4883 = vmatprep.mubr.msk.bf16.mxu0 %vm7042_vm0, %v326_v45 }
  0x4e   : > { %4884 = vmatmul.mubr.msk.bf16.gmra.mrb[28].mxu0 %vm7042_vm0, %v327_v48 }
  0x4f   : > { %4889 = vmatprep.mubr.msk.bf16.mxu0 %vm7064_vm1, %v1282_v54 }
  0xe9   : > { %v4857_v60 = vpop.f32.mrb[0].mxu0 }
  0xea   : > { %v435_v61 = vadd.f32 %v4857_v60, %v5694_v59  ;;  %v426_v62 = vpop.f32.mrb[1].mxu0 }
  0xeb   : > { %v427_v63 = vadd.f32 %v5694_v59, %v426_v62  ;;  %v4858_v0 = vpop.f32.mrb[2].mxu0  ;;  %v703_v62 = vand.u32 15, %v631_v42 }
  0xec   : > { %v555_v2 = vmax.f32 %v435_v61, 0.0  ;;  %v438_v3 = vadd.f32 %v4858_v0, %v5694_v59  ;;  %v429_v4 = vpop.f32.mrb[3].mxu0 }
  0xed   : > { %v553_v5 = vmax.f32 %v427_v63, 0.0  ;;  %v430_v6 = vadd.f32 %v5694_v59, %v429_v4  ;;  %v633_v4 = vadd.s32 64, %v5702_v9  ;;  %vm5799_vm6 = vcmp.ne.s32.totalorder %v703_v62, 0 }
  0xee   : > { %594 = vst.msk [vmem:[#allocation2 + $0x28] sm:$0xff] %vm7064_vm1, %v555_v2  ;;  %v556_v7 = vmax.f32 %v438_v3, 0.0 }
  0xef   : > { %592 = vst.msk [vmem:[#allocation2 + $0x18] sm:$0xff] %vm7064_vm1, %v553_v5  ;;  %v554_v8 = vmax.f32 %v430_v6, 0.0  ;;  %v635_v5 = vadd.s32 80, %v5702_v9 }
  0xf0   : > { %595 = vst.msk [vmem:[#allocation2 + $0x30] sm:$0xff] %vm7064_vm1, %v556_v7 }
  0xf1   : > { %593 = vst.msk [vmem:[#allocation2 + $0x20] sm:$0xff] %vm7064_vm1, %v554_v8  ;;  %v4861_v10 = vpop.f32.mrb[4].mxu0 }
  0xf2   : > { %v451_v12 = vadd.f32 %v4861_v10, %v5694_v59  ;;  %v442_v13 = vpop.f32.mrb[5].mxu0 }
  0xf3   : > { %v443_v14 = vadd.f32 %v5694_v59, %v442_v13  ;;  %v4862_v15 = vpop.f32.mrb[6].mxu0 }
  0xf4   : > { %v559_v16 = vmax.f32 %v451_v12, 0.0  ;;  %v454_v17 = vadd.f32 %v4862_v15, %v5694_v59  ;;  %v445_v18 = vpop.f32.mrb[7].mxu0 }
  0xf5   : > { %v557_v20 = vmax.f32 %v443_v14, 0.0  ;;  %v446_v21 = vadd.f32 %v5694_v59, %v445_v18  ;;  %v1254_v36 = vld [vmem:[#allocation2 + $0x28] sm:$0xff] }
  0xf6   : > { %598 = vst.msk [vmem:[#allocation2 + $0x48] sm:$0xff] %vm7064_vm1, %v559_v16  ;;  %v560_v23 = vmax.f32 %v454_v17, 0.0  ;;  %v5717_v24 = vld [vmem:[#allocation2 + $0x17] sm:$0xff] }
  0xf7   : > { %596 = vst.msk [vmem:[#allocation2 + $0x38] sm:$0xff] %vm7064_vm1, %v557_v20  ;;  %v558_v25 = vmax.f32 %v446_v21, 0.0  ;;  %v1252_v26 = vld [vmem:[#allocation2 + $0x18] sm:$0xff]  ;;  %v1255_v27 = vld [vmem:[#allocation2 + $0x30] sm:$0xff]  ;;  %v2147_v33 = vsel %vm5712_vm3, %v5717_v24, 0.0  ;;  %v5804_v20 = vadd.s32 8, %v5702_v9 }
  0xf8   : > { %599 = vst.msk [vmem:[#allocation2 + $0x50] sm:$0xff] %vm7064_vm1, %v560_v23  ;;  %v1253_v29 = vld [vmem:[#allocation2 + $0x20] sm:$0xff]  ;;  %v5737_v41 = vpack.c.bf16 %v1255_v27, %v1254_v36  ;;  %v5748_v47 = vld [vmem:[#allocation2 + $0x2f] sm:$0xff] }
  0xf9   : > { %v5722_v31 = vld [vmem:[#allocation2 + $0x1f] sm:$0xff]  ;;  %v5724_v32 = vld [vmem:[#allocation2 + $0x27] sm:$0xff]  ;;  %597 = vst.msk [vmem:[#allocation2 + $0x40] sm:$0xff] %vm7064_vm1, %v558_v25  ;;  %v4865_v34 = vpop.f32.mrb[8].mxu0  ;;  %v5730_v35 = vpack.c.bf16 %v1253_v29, %v1252_v26  ;;  %v717_v25 = vand.u32 15, %v633_v4  ;;  %v731_v26 = vand.u32 15, %v635_v5 }
  0xfa   : > { %v5734_v38 = vpack.c.bf16 %v5722_v31, %v2147_v33  ;;  %v467_v39 = vadd.f32 %v4865_v34, %v5694_v59  ;;  %v458_v40 = vpop.f32.mrb[9].mxu0  ;;  %v3093_v48 = vsel %vm5712_vm3, %v5724_v32, 0.0  ;;  %v2149_v60 = vsel %vm5756_vm4, %v5724_v32, 0.0 }
  0xfb   : > { %v459_v44 = vadd.f32 %v5694_v59, %v458_v40  ;;  %v4866_v45 = vpop.f32.mrb[10].mxu0  ;;  %4890 = vmatmul.mubr.msk.bf16.vlgmr.msra.gmra.mrb[32].mxu0 %vm7064_vm1, %v5730_v35  ;;  %v5761_v53 = vpack.c.bf16 %v5748_v47, %v3093_v48  ;;  %v5773_v0 = vpack.c.bf16 %v5748_v47, %v2149_v60  ;;  %v5835_v48 = vadd.s32 112, %v5702_v9 }
  0xfc   : > { %7133 = vst [vmem:[#allocation5_spill] sm:$0xff] %v5734_v38  ;;  %v563_v49 = vmax.f32 %v467_v39, 0.0  ;;  %v470_v50 = vadd.f32 %v4866_v45, %v5694_v59  ;;  %v461_v51 = vpop.f32.mrb[11].mxu0  ;;  %4893 = vmatprep.mubr.msk.bf16.mxu0 %vm7064_vm1, %v5737_v41  ;;  %4922 = vmatpush3.bf16.msra.mxu0 %v1562_v37  ;;  %vm5842_vm7 = vcmp.ne.s32.totalorder %v717_v25, 0  ;;  %vm5855_vm8 = vcmp.ne.s32.totalorder %v731_v26, 0 }
  0xfd   : > { %7136 = vst [vmem:[#allocation6_spill] sm:$0xff] %v5761_v53  ;;  %v561_v54 = vmax.f32 %v459_v44, 0.0  ;;  %v462_v58 = vadd.f32 %v5694_v59, %v461_v51  ;;  %5487 = vmatprep.subr.msk.bf16.mxu0 %vm7055_vm2, %v5743_v43  ;;  %7137 = vst [vmem:[#allocation7_spill] sm:$0xff] %v5773_v0  ;;  %v1258_v13 = vld [vmem:[#allocation2 + $0x48] sm:$0xff] }
  0xfe   : > { %602 = vst.msk [vmem:[#allocation2 + $0x68] sm:$0xff] %vm7064_vm1, %v563_v49  ;;  %v564_v61 = vmax.f32 %v470_v50, 0.0  ;;  %v5770_v63 = vld [vmem:[#allocation2 + $0x37] sm:$0xff] }
  0xff   : > { %600 = vst.msk [vmem:[#allocation2 + $0x58] sm:$0xff] %vm7064_vm1, %v561_v54  ;;  %v562_v1 = vmax.f32 %v462_v58, 0.0  ;;  %v1259_v2 = vld [vmem:[#allocation2 + $0x50] sm:$0xff]  ;;  %v1256_v6 = vld [vmem:[#allocation2 + $0x38] sm:$0xff]  ;;  %v2151_v10 = vsel %vm5776_vm5, %v5770_v63, 0.0  ;;  %v3095_v27 = vsel %vm5756_vm4, %v5770_v63, 0.0 }
 0x100   : > { %603 = vst.msk [vmem:[#allocation2 + $0x70] sm:$0xff] %vm7064_vm1, %v564_v61  ;;  %v1257_v7 = vld [vmem:[#allocation2 + $0x40] sm:$0xff]  ;;  %v5797_v18 = vpack.c.bf16 %v1259_v2, %v1258_v13  ;;  %v5815_v33 = vld [vmem:[#allocation2 + $0x4f] sm:$0xff]  ;;  %v641_v54 = vadd.s32 128, %v5702_v9  ;;  %v7146_v58 = vmov 0 }
 0x101   : > { %v5783_v8 = vld [vmem:[#allocation2 + $0x3f] sm:$0xff]  ;;  %601 = vst.msk [vmem:[#allocation2 + $0x60] sm:$0xff] %vm7064_vm1, %v562_v1  ;;  %v4869_v11 = vpop.f32.mrb[12].mxu0  ;;  %v5789_v12 = vpack.c.bf16 %v1257_v7, %v1256_v6  ;;  %v5791_v14 = vld [vmem:[#allocation2 + $0x47] sm:$0xff]  ;;  %v7147_v58 = vsel %vm5842_vm7, 4294967295, %v7146_v58  ;;  %v7148_v6 = vmov 0 }
 0x102   : > { %v5794_v15 = vpack.c.bf16 %v5783_v8, %v2151_v10  ;;  %v483_v16 = vadd.f32 %v4869_v11, %v5694_v59  ;;  %v474_v17 = vpop.f32.mrb[13].mxu0  ;;  %v5818_v34 = vpack.c.bf16 %v5783_v8, %v3095_v27  ;;  %v3097_v36 = vsel %vm5776_vm5, %v5791_v14, 0.0 }
 0x103   : > { %v475_v21 = vadd.f32 %v5694_v59, %v474_v17  ;;  %v4870_v23 = vpop.f32.mrb[14].mxu0  ;;  %4894 = vmatmul.mubr.msk.bf16.gmra.mrb[36].mxu0 %vm7064_vm1, %v5789_v12  ;;  %v5825_v40 = vpack.c.bf16 %v5815_v33, %v3097_v36  ;;  %v2153_v42 = vsel %vm5799_vm6, %v5791_v14, 0.0  ;;  %v7149_v6 = vsel %vm5855_vm8, 4294967295, %v7148_v6 }
 0x104   : > { %7140 = vst [vmem:[#allocation8_spill] sm:$0xff] %v5794_v15  ;;  %v567_v28 = vmax.f32 %v483_v16, 0.0  ;;  %v486_v29 = vadd.f32 %v4870_v23, %v5694_v59  ;;  %v477_v30 = vpop.f32.mrb[15].mxu0  ;;  %4897 = vmatprep.mubr.msk.bf16.mxu0 %vm7064_vm1, %v5797_v18  ;;  %7143 = vst [vmem:[#allocation9_spill] sm:$0xff] %v5818_v34  ;;  %v5838_v49 = vpack.c.bf16 %v5815_v33, %v2153_v42  ;;  %v668_v10 = vand.u32 15, %v5804_v20 }
 0x105   : > { %v565_v37 = vmax.f32 %v475_v21, 0.0  ;;  %v478_v39 = vadd.f32 %v5694_v59, %v477_v30  ;;  %7144 = vst [vmem:[#allocation10_spill] sm:$0xff] %v5825_v40  ;;  %v1262_v5 = vld [vmem:[#allocation2 + $0x68] sm:$0xff]  ;;  %v745_v21 = vand.u32 15, %v637_v46  ;;  %v759_v23 = vand.u32 15, %v5835_v48  ;;  %v5969_v40 = vld [vmem:[#allocation2 + $0x31] sm:$0xff] }
 0x106   : > { %606 = vst.msk [vmem:[#allocation2 + $0x88] sm:$0xff] %vm7064_vm1, %v567_v28  ;;  %v568_v44 = vmax.f32 %v486_v29, 0.0  ;;  %v5831_v45 = vld [vmem:[#allocation2 + $0x57] sm:$0xff]  ;;  %7145 = vst [vmem:[#allocation11_spill] sm:$0xff] %v5838_v49  ;;  %v773_v27 = vand.u32 15, %v641_v54  ;;  %v643_v20 = vadd.s32 144, %v5702_v9 }
 0x107   : > { %604 = vst.msk [vmem:[#allocation2 + $0x78] sm:$0xff] %vm7064_vm1, %v565_v37  ;;  %v566_v50 = vmax.f32 %v478_v39, 0.0  ;;  %v1263_v51 = vld [vmem:[#allocation2 + $0x70] sm:$0xff]  ;;  %v1260_v60 = vld [vmem:[#allocation2 + $0x58] sm:$0xff]  ;;  %v2155_v1 = vsel %vm5842_vm7, %v5831_v45, 0.0  ;;  %v3099_v28 = vsel %vm5799_vm6, %v5831_v45, 0.0 }
 0x108   : > { %607 = vst.msk [vmem:[#allocation2 + $0x90] sm:$0xff] %vm7064_vm1, %v568_v44  ;;  %v1261_v61 = vld [vmem:[#allocation2 + $0x60] sm:$0xff]  ;;  %v5866_v17 = vpack.c.bf16 %v1263_v51, %v1262_v5  ;;  %v5879_v37 = vld [vmem:[#allocation2 + $0x6f] sm:$0xff]  ;;  %v645_v54 = vadd.s32 160, %v5702_v9  ;;  %vm5905_vm9 = vcmp.ne.s32.totalorder %v745_v21, 0  ;;  %vm5909_vm10 = vcmp.ne.s32.totalorder %v668_v10, 15 }
 0x109   : > { %v5847_v62 = vld [vmem:[#allocation2 + $0x5f] sm:$0xff]  ;;  %605 = vst.msk [vmem:[#allocation2 + $0x80] sm:$0xff] %vm7064_vm1, %v566_v50  ;;  %v4873_v2 = vpop.f32.mrb[16].mxu0  ;;  %v5853_v4 = vpack.c.bf16 %v1261_v61, %v1260_v60  ;;  %v5859_v7 = vld [vmem:[#allocation2 + $0x67] sm:$0xff]  ;;  %v5899_v61 = vadd.s32 24, %v5702_v9  ;;  %vm5928_vm11 = vcmp.ne.s32.totalorder %v773_v27, 0 }
 0x10a   : > { %v5863_v11 = vpack.c.bf16 %v5847_v62, %v2155_v1  ;;  %v499_v13 = vadd.f32 %v4873_v2, %v5694_v59  ;;  %v490_v16 = vpop.f32.mrb[17].mxu0  ;;  %v5882_v39 = vpack.c.bf16 %v5847_v62, %v3099_v28  ;;  %v3101_v42 = vsel %vm5842_vm7, %v5859_v7, 0.0  ;;  %7175 = vst [vmem:[#allocation27_spill] sm:$0xff] %v5969_v40  ;;  %v6245_v52 = vld [vmem:[#allocation2 + $0x69] sm:$0xff] }
 0x10b   : > { %v491_v25 = vadd.f32 %v5694_v59, %v490_v16  ;;  %v4874_v26 = vpop.f32.mrb[18].mxu0  ;;  %4898 = vmatmul.mubr.msk.bf16.gmra.mrb[40].mxu0 %vm7064_vm1, %v5853_v4  ;;  %v5889_v48 = vpack.c.bf16 %v5879_v37, %v3101_v42  ;;  %v2157_v50 = vsel %vm5855_vm8, %v5859_v7, 0.0  ;;  %v7155_v16 = vmov 0 }
 0x10c   : > { %7150 = vst [vmem:[#allocation12_spill] sm:$0xff] %v5863_v11  ;;  %v571_v29 = vmax.f32 %v499_v13, 0.0  ;;  %v502_v30 = vadd.f32 %v4874_v26, %v5694_v59  ;;  %v493_v36 = vpop.f32.mrb[19].mxu0  ;;  %4901 = vmatprep.mubr.msk.bf16.mxu0 %vm7064_vm1, %v5866_v17  ;;  %7151 = vst [vmem:[#allocation13_spill] sm:$0xff] %v5882_v39  ;;  %v5902_v1 = vpack.c.bf16 %v5879_v37, %v2157_v50  ;;  %v787_v13 = vand.u32 15, %v643_v20 }
 0x10d   : > { %v569_v44 = vmax.f32 %v491_v25, 0.0  ;;  %v494_v46 = vadd.f32 %v5694_v59, %v493_v36  ;;  %7152 = vst [vmem:[#allocation14_spill] sm:$0xff] %v5889_v48  ;;  %v7156_v16 = vsel %vm5905_vm9, 4294967295, %v7155_v16  ;;  %v7157_v25 = vmov 0  ;;  %v1266_v42 = vld [vmem:[#allocation2 + $0x88] sm:$0xff] }
 0x10e   : > { %610 = vst.msk [vmem:[#allocation2 + $0xa8] sm:$0xff] %vm7064_vm1, %v571_v29  ;;  %v572_v51 = vmax.f32 %v502_v30, 0.0  ;;  %v5896_v60 = vld [vmem:[#allocation2 + $0x77] sm:$0xff]  ;;  %7154 = vst [vmem:[#allocation16_spill] sm:$0xff] %v5902_v1  ;;  %v7158_v25 = vsel %vm5909_vm10, 4294967295, %v7157_v25  ;;  %v5917_v30 = vadd.s32 40, %v5702_v9 }
 0x10f   : > { %7153 = vst [vmem:[#allocation15_spill] sm:$0xff] %v5896_v60  ;;  %608 = vst.msk [vmem:[#allocation2 + $0x98] sm:$0xff] %vm7064_vm1, %v569_v44  ;;  %v570_v2 = vmax.f32 %v494_v46, 0.0  ;;  %v1267_v5 = vld [vmem:[#allocation2 + $0x90] sm:$0xff]  ;;  %v1264_v26 = vld [vmem:[#allocation2 + $0x78] sm:$0xff]  ;;  %v5920_v36 = vadd.s32 56, %v5702_v9 }
 0x110   : > { %7159 = vst [vmem:[#allocation17_spill] sm:$0xff] %v7158_v25  ;;  %611 = vst.msk [vmem:[#allocation2 + $0xb0] sm:$0xff] %vm7064_vm1, %v572_v51  ;;  %v1265_v28 = vld [vmem:[#allocation2 + $0x80] sm:$0xff]  ;;  %v2159_v21 = vsel %vm5905_vm9, %v5896_v60, 0.0  ;;  %v7162_v44 = vmov 0  ;;  %vm5932_vm12 = vcmp.ne.s32.totalorder %v759_v23, 0  ;;  %v5940_v48 = vpack.c.bf16 %v1267_v5, %v1266_v42 }
 0x111   : > { %v5914_v29 = vld [vmem:[#allocation2 + $0x7f] sm:$0xff]  ;;  %609 = vst.msk [vmem:[#allocation2 + $0xa0] sm:$0xff] %vm7064_vm1, %v570_v2  ;;  %v4877_v10 = vpop.f32.mrb[20].mxu0  ;;  %v5926_v20 = vpack.c.bf16 %v1265_v28, %v1264_v26  ;;  %v7163_v44 = vsel %vm5928_vm11, 4294967295, %v7162_v44  ;;  %v7165_v46 = vmov 0  ;;  %v801_v2 = vand.u32 15, %v645_v54 }
 0x112   : > { %7160 = vst [vmem:[#allocation18_spill] sm:$0xff] %v5914_v29  ;;  %7164 = vst [vmem:[#allocation20_spill] sm:$0xff] %v7163_v44  ;;  %v7166_v46 = vsel %vm5932_vm12, 4294967295, %v7165_v46  ;;  %v5937_v50 = vpack.c.bf16 %v5914_v29, %v2159_v21  ;;  %v515_v51 = vadd.f32 %v4877_v10, %v5694_v59  ;;  %v506_v1 = vpop.f32.mrb[21].mxu0  ;;  %v5943_v26 = vadd.s32 176, %v5702_v9  ;;  %v3073_v27 = vld [vmem:[#allocation2 + $0x87] sm:$0xff] }
 0x113   : > { %7161 = vst [vmem:[#allocation19_spill] sm:$0xff] %v5926_v20  ;;  %7167 = vst [vmem:[#allocation21_spill] sm:$0xff] %v7166_v46  ;;  %v507_v28 = vadd.f32 %v5694_v59, %v506_v1  ;;  %v4878_v39 = vpop.f32.mrb[22].mxu0  ;;  %4902 = vmatmul.mubr.msk.bf16.gmra.mrb[44].mxu0 %vm7064_vm1, %v5926_v20  ;;  %vm5948_vm13 = vcmp.ne.s32.totalorder %v787_v13, 0  ;;  %v7170_v23 = vmov 0  ;;  %v5953_v21 = vadd.s32 192, %v5702_v9 }
 0x114   : > { %7168 = vst [vmem:[#allocation22_spill] sm:$0xff] %v5937_v50  ;;  %7169 = vst [vmem:[#allocation23_spill] sm:$0xff] %v5940_v48  ;;  %v7171_v23 = vsel %vm5948_vm13, 4294967295, %v7170_v23  ;;  %v3103_v54 = vsel %vm5855_vm8, %v5896_v60, 0.0  ;;  %v575_v5 = vmax.f32 %v515_v51, 0.0  ;;  %v518_v10 = vadd.f32 %v4878_v39, %v5694_v59  ;;  %v509_v42 = vpop.f32.mrb[23].mxu0  ;;  %4905 = vmatprep.mubr.msk.bf16.mxu0 %vm7064_vm1, %v5940_v48 }
 0x115   : > { %7172 = vst [vmem:[#allocation24_spill] sm:$0xff] %v7171_v23  ;;  %v5961_v1 = vld [vmem:[#allocation2 + $0x8f] sm:$0xff]  ;;  %v5964_v13 = vpack.c.bf16 %v5914_v29, %v3103_v54  ;;  %v3105_v50 = vsel %vm5905_vm9, %v3073_v27, 0.0  ;;  %v573_v11 = vmax.f32 %v507_v28, 0.0  ;;  %v510_v49 = vadd.f32 %v5694_v59, %v509_v42  ;;  %v6143_v20 = vld [vmem:[#allocation2 + $0x39] sm:$0xff] }
 0x116   : > { %7173 = vst [vmem:[#allocation25_spill] sm:$0xff] %v5961_v1  ;;  %v5972_v51 = vpack.c.bf16 %v5961_v1, %v3105_v50  ;;  %v2161_v39 = vsel %vm5932_vm12, %v3073_v27, 0.0  ;;  %614 = vst.msk [vmem:[#allocation2 + $0xc8] sm:$0xff] %vm7064_vm1, %v575_v5  ;;  %v576_v34 = vmax.f32 %v518_v10, 0.0  ;;  %v2131_v15 = vld [vmem:[#allocation2 + $0x97] sm:$0xff]  ;;  %vm5977_vm14 = vcmp.ne.s32.totalorder %v801_v2, 0 }
 0x117   : > { %7174 = vst [vmem:[#allocation26_spill] sm:$0xff] %v5964_v13  ;;  %v7177_v54 = vmov 0  ;;  %v815_v28 = vand.u32 15, %v5943_v26  ;;  %v5983_v42 = vpack.c.bf16 %v5961_v1, %v2161_v39  ;;  %612 = vst.msk [vmem:[#allocation2 + $0xb8] sm:$0xff] %vm7064_vm1, %v573_v11  ;;  %v574_v50 = vmax.f32 %v510_v49, 0.0  ;;  %v1270_v13 = vld [vmem:[#allocation2 + $0xa8] sm:$0xff] }
 0x118   : > { %7176 = vst [vmem:[#allocation28_spill] sm:$0xff] %v5972_v51  ;;  %v7178_v54 = vsel %vm5977_vm14, 4294967295, %v7177_v54  ;;  %v1268_v51 = vld [vmem:[#allocation2 + $0x98] sm:$0xff]  ;;  %v2163_v27 = vsel %vm5928_vm11, %v2131_v15, 0.0  ;;  %v1271_v5 = vld [vmem:[#allocation2 + $0xb0] sm:$0xff]  ;;  %v1219_v2 = vsel %vm5948_vm13, %v2131_v15, 0.0 }
 0x119   : > { %7179 = vst [vmem:[#allocation29_spill] sm:$0xff] %v7178_v54  ;;  %7180 = vst [vmem:[#allocation30_spill] sm:$0xff] %v5983_v42  ;;  %v1269_v10 = vld [vmem:[#allocation2 + $0xa0] sm:$0xff]  ;;  %v5993_v39 = vpack.c.bf16 %v1271_v5, %v1270_v13  ;;  %v2540_v49 = vsel %vm7055_vm2, %v5683_v57, 0  ;;  %v829_v11 = vand.u32 15, %v5953_v21  ;;  %v4881_v15 = vpop.f32.mrb[24].mxu0 }
 0x11a   : > { %615 = vst.msk [vmem:[#allocation2 + $0xd0] sm:$0xff] %vm7064_vm1, %v576_v34  ;;  %v2132_v0 = vld [vmem:[#allocation2 + $0x9f] sm:$0xff]  ;;  %v5991_v26 = vld [vmem:[#allocation2 + $0xa7] sm:$0xff]  ;;  %613 = vst.msk [vmem:[#allocation2 + $0xc0] sm:$0xff] %vm7064_vm1, %v574_v50  ;;  %v6002_v53 = vpack.c.bf16 %v1269_v10, %v1268_v51  ;;  %v531_v21 = vadd.f32 %v4881_v15, %v5694_v59  ;;  %v522_v38 = vpop.f32.mrb[25].mxu0  ;;  %vm6033_vm15 = vcmp.ne.s32.totalorder %v815_v28, 0 }
 0x11b   : > { %7181 = vst [vmem:[#allocation31_spill] sm:$0xff] %v5991_v26  ;;  %7182 = vst [vmem:[#allocation32_spill] sm:$0xff] %v5993_v39  ;;  %v2187_v34 = vpack.c.bf16 %v2132_v0, %v2163_v27  ;;  %v2134_v5 = vld [vmem:[#allocation2 + $0xaf] sm:$0xff]  ;;  %v2165_v57 = vsel %vm5948_vm13, %v5991_v26, 0.0  ;;  %v6011_v42 = vpack.c.bf16 %v2132_v0, %v1219_v2  ;;  %v1221_v51 = vsel %vm5977_vm14, %v5991_v26, 0.0  ;;  %v4882_v27 = vpop.f32.mrb[26].mxu0 }
 0x11c   : > { %7183 = vst [vmem:[#allocation33_spill] sm:$0xff] %v6002_v53  ;;  %v2188_v56 = vpack.c.bf16 %v2134_v5, %v2165_v57  ;;  %v523_v50 = vadd.f32 %v5694_v59, %v522_v38  ;;  %4906 = vmatmul.mubr.msk.bf16.gmra.mrb[48].mxu0 %vm7064_vm1, %v6002_v53  ;;  %v6023_v10 = vld [vmem:[%s7034_s2 + $0xa] sm:$0x3]  ;;  %v6025_v15 = vpack.c.bf16 %v2134_v5, %v1221_v51  ;;  %v682_v0 = vand.u32 15, %v5899_v61  ;;  %v525_v13 = vpop.f32.mrb[27].mxu0  ;;  %v6241_v25 = vld [vmem:[#allocation2 + $0x59] sm:$0xff] }
 0x11d   : > { %7184 = vst [vmem:[#allocation34_spill] sm:$0xff] %v6011_v42  ;;  %5007 = vmatprep.mubr.msk.bf16.mxu1 %vm7064_vm1, %v2187_v34  ;;  %v579_v57 = vmax.f32 %v531_v21, 0.0  ;;  %v534_v38 = vadd.f32 %v4882_v27, %v5694_v59  ;;  %4909 = vmatprep.mubr.msk.bf16.mxu0 %vm7064_vm1, %v5993_v39  ;;  %v7186_v34 = vmov 0  ;;  %v651_v5 = vadd.s32 208, %v5702_v9  ;;  %v1274_v1 = vld [vmem:[#allocation2 + $0xc8] sm:$0xff]  ;;  %7208 = vst [vmem:[#allocation45_spill] sm:$0xff] %v6143_v20 }
 0x11e   : > { %7185 = vst [vmem:[#allocation35_spill] sm:$0xff] %v6025_v15  ;;  %5008 = vmatmul.mubr.msk.bf16.vlgmr.msra.gmra.mrb[0].mxu1 %vm7064_vm1, %v2188_v56  ;;  %v7187_v34 = vsel %vm6033_vm15, 4294967295, %v7186_v34  ;;  %v577_v51 = vmax.f32 %v523_v50, 0.0  ;;  %v526_v61 = vadd.f32 %v5694_v59, %v525_v13  ;;  %v6041_v27 = vadd.s32 72, %v5702_v9  ;;  %v2135_v23 = vld [vmem:[#allocation2 + $0xb7] sm:$0xff] }
 0x11f   : > { %7188 = vst [vmem:[#allocation36_spill] sm:$0xff] %v7187_v34  ;;  %5024 = vmatpush3.bf16.msra.mxu1 %v2540_v49  ;;  %618 = vst.msk [vmem:[#allocation2 + $0xe8] sm:$0xff] %vm7064_vm1, %v579_v57  ;;  %v580_v2 = vmax.f32 %v534_v38, 0.0  ;;  %vm6044_vm0 = vcmp.ne.s32.totalorder %v829_v11, 0  ;;  %v7189_v56 = vmov 0  ;;  %v6051_v28 = vadd.s32 88, %v5702_v9 }
 0x120   : > { %v7190_v56 = vsel %vm6044_vm0, 4294967295, %v7189_v56  ;;  %5491 = vmatprep.subr.msk.bf16.mxu1 %vm7055_vm2, %v6023_v10  ;;  %v6054_v49 = vadd.s32 104, %v5702_v9  ;;  %616 = vst.msk [vmem:[#allocation2 + $0xd8] sm:$0xff] %vm7064_vm1, %v577_v51  ;;  %v578_v13 = vmax.f32 %v526_v61, 0.0  ;;  %v1272_v50 = vld [vmem:[#allocation2 + $0xb8] sm:$0xff]  ;;  %v2167_v57 = vsel %vm5977_vm14, %v2135_v23, 0.0 }
 0x121   : > { %7191 = vst [vmem:[#allocation37_spill] sm:$0xff] %v7190_v56  ;;  %v1275_v11 = vld [vmem:[#allocation2 + $0xd0] sm:$0xff]  ;;  %v653_v38 = vadd.s32 224, %v5702_v9  ;;  %v1223_v21 = vsel %vm6033_vm15, %v2135_v23, 0.0  ;;  %619 = vst.msk [vmem:[#allocation2 + $0xf0] sm:$0xff] %vm7064_vm1, %v580_v2  ;;  %v1273_v26 = vld [vmem:[#allocation2 + $0xc0] sm:$0xff] }
 0x122   : > { %v2136_v39 = vld [vmem:[#allocation2 + $0xbf] sm:$0xff]  ;;  %v2137_v15 = vld [vmem:[#allocation2 + $0xc7] sm:$0xff]  ;;  %v843_v42 = vand.u32 15, %v651_v5  ;;  %v6064_v53 = vadd.s32 120, %v5702_v9  ;;  %v6067_v51 = vadd.s32 136, %v5702_v9  ;;  %617 = vst.msk [vmem:[#allocation2 + $0xe0] sm:$0xff] %vm7064_vm1, %v578_v13  ;;  %v6070_v54 = vpack.c.bf16 %v1273_v26, %v1272_v50 }
 0x123   : > { %v4885_v61 = vpop.f32.mrb[28].mxu0  ;;  %v2189_v48 = vpack.c.bf16 %v2136_v39, %v2167_v57  ;;  %v2138_v23 = vld [vmem:[#allocation2 + $0xcf] sm:$0xff]  ;;  %v2169_v2 = vsel %vm6033_vm15, %v2137_v15, 0.0  ;;  %v6074_v29 = vpack.c.bf16 %v2136_v39, %v1223_v21  ;;  %v6077_v46 = vpack.c.bf16 %v1275_v11, %v1274_v1 }
 0x124   : > { %7192 = vst [vmem:[#allocation38_spill] sm:$0xff] %v6070_v54  ;;  %v547_v5 = vadd.f32 %v4885_v61, %v5694_v59  ;;  %v538_v44 = vpop.f32.mrb[29].mxu0  ;;  %v2190_v60 = vpack.c.bf16 %v2138_v23, %v2169_v2  ;;  %v1225_v13 = vsel %vm6044_vm0, %v2137_v15, 0.0  ;;  %4910 = vmatmul.mubr.msk.bf16.gmra.mrb[52].mxu0 %vm7064_vm1, %v6070_v54  ;;  %v857_v57 = vand.u32 15, %v653_v38  ;;  %v7286_v19 = vld [vmem:[#allocation15_spill] sm:$0xff] }
 0x125   : > { %7193 = vst [vmem:[#allocation39_spill] sm:$0xff] %v6074_v29  ;;  %7194 = vst [vmem:[#allocation40_spill] sm:$0xff] %v6077_v46  ;;  %v539_v26 = vadd.f32 %v5694_v59, %v538_v44  ;;  %v4886_v50 = vpop.f32.mrb[30].mxu0  ;;  %5011 = vmatprep.mubr.msk.bf16.mxu1 %vm7064_vm1, %v2189_v48  ;;  %v6085_v39 = vpack.c.bf16 %v2138_v23, %v1225_v13  ;;  %v724_v21 = vand.u32 15, %v6041_v27  ;;  %4913 = vmatprep.mubr.msk.bf16.mxu0 %vm7064_vm1, %v6077_v46  ;;  %v7198_v15 = vmov 0  ;;  %v1105_v29 = vld [vmem:[#allocation2 + $0x7] sm:$0xff] }
 0x126   : > { %v583_v61 = vmax.f32 %v547_v5, 0.0  ;;  %v550_v1 = vadd.f32 %v4886_v50, %v5694_v59  ;;  %v541_v11 = vpop.f32.mrb[31].mxu0  ;;  %5012 = vmatmul.mubr.msk.bf16.gmra.mrb[4].mxu1 %vm7064_vm1, %v2190_v60  ;;  %vm6092_vm2 = vcmp.ne.s32.totalorder %v843_v42, 0  ;;  %v655_v48 = vadd.s32 240, %v5702_v9  ;;  %v1278_v34 = vld [vmem:[#allocation2 + $0xe8] sm:$0xff] }
 0x127   : > { %7195 = vst [vmem:[#allocation41_spill] sm:$0xff] %v6085_v39  ;;  %vm6097_vm15 = vcmp.ne.s32.totalorder %v682_v0, 15  ;;  %v581_v27 = vmax.f32 %v539_v26, 0.0  ;;  %v542_v38 = vadd.f32 %v5694_v59, %v541_v11  ;;  %v7201_v23 = vand.u32 15, %v5917_v30  ;;  %v2139_v0 = vld [vmem:[#allocation2 + $0xd7] sm:$0xff]  ;;  %v6249_v44 = vld [vmem:[#allocation2 + $0x81] sm:$0xff] }
 0x128   : > { %v7199_v15 = vsel %vm6097_vm15, 4294967295, %v7198_v15  ;;  %v7202_v2 = vmov 0  ;;  %v738_v60 = vand.u32 15, %v6051_v28  ;;  %v752_v42 = vand.u32 15, %v6054_v49  ;;  %622 = vst.msk [vmem:[#allocation2 + $0x108] sm:$0xff] %vm7064_vm1, %v583_v61  ;;  %v1276_v50 = vld [vmem:[#allocation2 + $0xd8] sm:$0xff] }
 0x129   : > { %7200 = vst [vmem:[#allocation42_spill] sm:$0xff] %v7199_v15  ;;  %vm6104_vm14 = vcmp.ne.s32.totalorder %v7201_v23, 15  ;;  %v584_v5 = vmax.f32 %v550_v1, 0.0  ;;  %v766_v13 = vand.u32 15, %v6064_v53  ;;  %v780_v26 = vand.u32 15, %v6067_v51  ;;  %620 = vst.msk [vmem:[#allocation2 + $0xf8] sm:$0xff] %vm7064_vm1, %v581_v27 }
 0x12a   : > { %v7203_v2 = vsel %vm6104_vm14, 4294967295, %v7202_v2  ;;  %v6114_v59 = vadd.s32 152, %v5702_v9  ;;  %v582_v30 = vmax.f32 %v542_v38, 0.0  ;;  %v2171_v28 = vsel %vm6044_vm0, %v2139_v0, 0.0  ;;  %v1279_v11 = vld [vmem:[#allocation2 + $0xf0] sm:$0xff]  ;;  %v1277_v51 = vld [vmem:[#allocation2 + $0xe0] sm:$0xff] }
 0x12b   : > { %7204 = vst [vmem:[#allocation43_spill] sm:$0xff] %v7203_v2  ;;  %vm6119_vm13 = vcmp.ne.s32.totalorder %v857_v57, 0  ;;  %v1227_v53 = vsel %vm6092_vm2, %v2139_v0, 0.0  ;;  %623 = vst.msk [vmem:[#allocation2 + $0x110] sm:$0xff] %vm7064_vm1, %v584_v5  ;;  %v2140_v61 = vld [vmem:[#allocation2 + $0xdf] sm:$0xff]  ;;  %v2141_v1 = vld [vmem:[#allocation2 + $0xe7] sm:$0xff]  ;;  %v6133_v57 = vpack.c.bf16 %v1277_v51, %v1276_v50  ;;  %v6139_v39 = vpack.c.bf16 %v1279_v11, %v1278_v34 }
 0x12c   : > { %v871_v23 = vand.u32 15, %v655_v48  ;;  %v6127_v27 = vadd.s32 168, %v5702_v9  ;;  %v6130_v38 = vadd.s32 184, %v5702_v9  ;;  %621 = vst.msk [vmem:[#allocation2 + $0x100] sm:$0xff] %vm7064_vm1, %v582_v30  ;;  %v2191_v56 = vpack.c.bf16 %v2140_v61, %v2171_v28  ;;  %v2142_v46 = vld [vmem:[#allocation2 + $0xef] sm:$0xff]  ;;  %v6145_v30 = vld [vmem:[#allocation2 + $0x41] sm:$0xff] }
 0x12d   : > { %v2173_v5 = vsel %vm6092_vm2, %v2141_v1, 0.0  ;;  %v6137_v0 = vpack.c.bf16 %v2140_v61, %v1227_v53  ;;  %7207 = vst [vmem:[#allocation44_spill] sm:$0xff] %v6139_v39  ;;  %v1229_v54 = vsel %vm6119_vm13, %v2141_v1, 0.0  ;;  %7209 = vst [vmem:[#allocation46_spill] sm:$0xff] %v6145_v30  ;;  %v7210_v50 = vand.u32 15, %v5920_v36  ;;  %v6162_v53 = vld [vmem:[#allocation2 + $0x51] sm:$0xff] }
 0x12e   : > { %v2192_v48 = vpack.c.bf16 %v2142_v46, %v2173_v5  ;;  %v7211_v28 = vmov 0  ;;  %vm7214_vm0 = vcmask 31744   ;;  %v6156_v34 = vpack.c.bf16 %v2142_v46, %v1229_v54  ;;  %7220 = vst [vmem:[#allocation50_spill] sm:$0xff] %v6162_v53  ;;  %v6164_v51 = vld [vmem:[#allocation2 + $0x61] sm:$0xff]  ;;  %v6166_v36 = vld [vmem:[#allocation2 + $0x71] sm:$0xff]  ;;  %v6179_v54 = vld [vmem:[#allocation2 + $0x29] sm:$0xff] }
 0x12f   : > { %vm6149_vm1 = vcmp.ne.s32.totalorder %v7210_v50, 15  ;;  %4914 = vmatmul.mubr.msk.bf16.gmra.mrb[56].mxu0 %vm7214_vm0, %v6133_v57  ;;  %vm7215_vm11 = vmmov %vm7214_vm0  ;;  %vm6158_vm12 = vcmp.ne.s32.totalorder %v724_v21, 15  ;;  %v7217_v11 = vmov 0  ;;  %7221 = vst [vmem:[#allocation51_spill] sm:$0xff] %v6164_v51  ;;  %v650_v61 = vadd.s32 200, %v5702_v9  ;;  %v1106_v50 = vld [vmem:[#allocation2 + $0xf] sm:$0xff] }
 0x130   : > { %v7212_v28 = vsel %vm6149_vm1, 4294967295, %v7211_v28  ;;  %5015 = vmatprep.mubr.msk.bf16.mxu1 %vm7215_vm11, %v2191_v56  ;;  %7216 = vst [vmem:[#allocation48_spill] sm:$0xff] %v6156_v34  ;;  %v7218_v11 = vsel %vm6158_vm12, 4294967295, %v7217_v11  ;;  %7222 = vst [vmem:[#allocation52_spill] sm:$0xff] %v6166_v36  ;;  %v6170_v1 = vadd.s32 216, %v5702_v9  ;;  %4917 = vmatprep.mubr.msk.bf16.mxu0 %vm7214_vm0, %v6139_v39  ;;  %vm6175_vm9 = vcmp.ne.s32.totalorder %v871_v23, 0 }
 0x131   : > { %7213 = vst [vmem:[#allocation47_spill] sm:$0xff] %v7212_v28  ;;  %7219 = vst [vmem:[#allocation49_spill] sm:$0xff] %v7218_v11  ;;  %v7224_v46 = vmov 0  ;;  %v794_v56 = vand.u32 15, %v6114_v59  ;;  %v808_v21 = vand.u32 15, %v6127_v27  ;;  %v654_v5 = vadd.s32 232, %v5702_v9 }
 0x132   : > { %vm7223_vm11 = vmmov %vm7214_vm0  ;;  %v7225_v46 = vsel %vm6175_vm9, 4294967295, %v7224_v46  ;;  %7227 = vst [vmem:[#allocation54_spill] sm:$0xff] %v6179_v54  ;;  %v1201_v34 = vsel %vm5712_vm3, %v1105_v29, 0.0  ;;  %vm6186_vm8 = vcmp.ne.s32.totalorder %v738_v60, 15  ;;  %vm6190_vm0 = vcmp.ne.s32.totalorder %v752_v42, 15  ;;  %v2143_v42 = vld [vmem:[#allocation2 + $0xf7] sm:$0xff] }
 0x133   : > { %5016 = vmatmul.mubr.msk.bf16.gmra.mrb[8].mxu1 %vm7223_vm11, %v2192_v48  ;;  %7226 = vst [vmem:[#allocation53_spill] sm:$0xff] %v7225_v46  ;;  %vm6194_vm11 = vcmp.ne.s32.totalorder %v766_v13, 15  ;;  %v7232_v48 = vmov 0  ;;  %vm6198_vm7 = vcmp.ne.s32.totalorder %v780_v26, 15  ;;  %v7235_v59 = vmov 0  ;;  %v2146_v15 = vld [vmem:[#allocation2 + $0x10f] sm:$0xff] }
 0x134   : > { %v7233_v48 = vsel %vm6194_vm11, 4294967295, %v7232_v48  ;;  %v7236_v59 = vsel %vm6198_vm7, 4294967295, %v7235_v59  ;;  %v822_v27 = vand.u32 15, %v6130_v38  ;;  %v7238_v22 = vsel %vm5909_vm10, %v5969_v40, 0.0  ;;  %v6287_v46 = vld [vmem:[#allocation2 + $0xa9] sm:$0xff] }
 0x135   : > { %7234 = vst [vmem:[#allocation55_spill] sm:$0xff] %v7233_v48  ;;  %7237 = vst [vmem:[#allocation56_spill] sm:$0xff] %v7236_v59  ;;  %v6208_v29 = vpack.c.bf16 %v7238_v22, %v6179_v54  ;;  %v3716_v60 = vsel %vm6097_vm15, %v6145_v30, 0.0  ;;  %v3718_v26 = vsel %vm6104_vm14, %v6162_v53, 0.0  ;;  %v3720_v38 = vsel %vm6149_vm1, %v6164_v51, 0.0  ;;  %v1281_v54 = vld [vmem:[#allocation2 + $0x100] sm:$0xff] }
 0x136   : > { %v6214_v13 = vpack.c.bf16 %v3716_v60, %v6143_v20  ;;  %v3722_v22 = vsel %vm6158_vm12, %v6166_v36, 0.0  ;;  %v2175_v9 = vsel %vm6119_vm13, %v2143_v42, 0.0  ;;  %v1231_v60 = vsel %vm6175_vm9, %v2143_v42, 0.0  ;;  %v2144_v53 = vld [vmem:[#allocation2 + $0xff] sm:$0xff]  ;;  %v2145_v30 = vld [vmem:[#allocation2 + $0x107] sm:$0xff] }
 0x137   : > { %7239 = vst [vmem:[#allocation57_spill] sm:$0xff] %v6208_v29  ;;  %v1280_v29 = vld [vmem:[#allocation2 + $0xf8] sm:$0xff]  ;;  %v850_v20 = vand.u32 15, %v6170_v1  ;;  %v1233_v2 = vpack.c.bf16 %v1106_v50, %v1201_v34  ;;  %v1203_v51 = vsel %vm5756_vm4, %v5717_v24, 0.0  ;;  %v864_v11 = vand.u32 15, %v654_v5  ;;  %v6243_v50 = vld [vmem:[#allocation2 + $0x49] sm:$0xff] }
 0x138   : > { %7240 = vst [vmem:[#allocation58_spill] sm:$0xff] %v6214_v13  ;;  %v836_v13 = vand.u32 15, %v650_v61  ;;  %v3119_v36 = vsel %vm6092_vm2, %v2143_v42, 0.0  ;;  %v6235_v28 = vpack.c.bf16 %v1281_v54, %v1280_v29  ;;  %v2193_v40 = vpack.c.bf16 %v2144_v53, %v2175_v9  ;;  %v6247_v24 = vld [vmem:[#allocation2 + $0x79] sm:$0xff]  ;;  %v6251_v54 = vld [vmem:[#allocation2 + $0x91] sm:$0xff]  ;;  %v7392_v39 = vld [vmem:[#allocation10_spill] sm:$0xff] }
 0x139   : > { %v2177_v61 = vsel %vm6175_vm9, %v2145_v30, 0.0  ;;  %v6239_v1 = vpack.c.bf16 %v2144_v53, %v1231_v60  ;;  %7241 = vst [vmem:[#allocation59_spill] sm:$0xff] %v6251_v54  ;;  %vm6253_vm2 = vcmp.ne.s32.totalorder %v794_v56, 15  ;;  %vm6257_vm3 = vcmp.ne.s32.totalorder %v808_v21, 15  ;;  %v6266_v42 = vld [vmem:[#allocation2 + $0x99] sm:$0xff]  ;;  %v6268_v60 = vld [vmem:[#allocation2 + $0xa1] sm:$0xff] }
 0x13a   : > { %v2194_v34 = vpack.c.bf16 %v2146_v15, %v2177_v61  ;;  %v6261_v29 = vpack.c.bf16 %v2144_v53, %v3119_v36  ;;  %vm7247_vm4 = vcmask 31744   ;;  %7249 = vst [vmem:[#allocation61_spill] sm:$0xff] %v6268_v60  ;;  %v6270_v61 = vld [vmem:[#allocation2 + $0xb1] sm:$0xff]  ;;  %vm6272_vm12 = vcmp.ne.s32.totalorder %v822_v27, 15  ;;  %v6285_v36 = vld [vmem:[#allocation2 + $0x89] sm:$0xff]  ;;  %v6289_v27 = vld [vmem:[#allocation2 + $0xb9] sm:$0xff] }
 0x13b   : > { %4918 = vmatmul.mubr.msk.bf16.gmra.mrb[60].mxu0 %vm7247_vm4, %v6235_v28  ;;  %vm7248_vm9 = vmmov %vm7247_vm4  ;;  %7250 = vst [vmem:[#allocation62_spill] sm:$0xff] %v6270_v61  ;;  %vm6276_vm1 = vcmp.ne.s32.totalorder %v836_v13, 15  ;;  %v7253_v21 = vmov 0  ;;  %v3121_v53 = vsel %vm6119_vm13, %v2145_v30, 0.0  ;;  %vm6293_vm14 = vcmp.ne.s32.totalorder %v850_v20, 15  ;;  %v6312_v20 = vld [vmem:[#allocation2 + $0xf1] sm:$0xff] }
 0x13c   : > { %7246 = vst [vmem:[#allocation60_spill] sm:$0xff] %v6261_v29  ;;  %5019 = vmatprep.mubr.msk.bf16.mxu1 %vm7248_vm9, %v2193_v40  ;;  %v7254_v21 = vsel %vm6276_vm1, 4294967295, %v7253_v21  ;;  %vm7255_vm9 = vmmov %vm7247_vm4  ;;  %v1234_v40 = vpack.c.bf16 %v5722_v31, %v1203_v51  ;;  %v6291_v29 = vld [vmem:[#allocation2 + $0xc1] sm:$0xff]  ;;  %v7256_v13 = vmov 0  ;;  %vm6297_vm15 = vcmp.ne.s32.totalorder %v864_v11, 15  ;;  %v6357_v59 = vld [vmem:[#allocation2 + $0xf9] sm:$0xff] }
 0x13d   : > { %5020 = vmatmul.mubr.msk.bf16.gmra.mrb[12].mxu1 %vm7247_vm4, %v2194_v34  ;;  %4923 = vmatprep.mubr.msk.bf16.mxu0 %vm7255_vm9, %v1233_v2  ;;  %v7257_v13 = vsel %vm6293_vm14, 4294967295, %v7256_v13  ;;  %v7258_v49 = vmov 0  ;;  %v6301_v30 = vpack.c.bf16 %v2146_v15, %v3121_v53  ;;  %vm7261_vm13 = vmmov %vm7247_vm4  ;;  %v1205_v31 = vsel %vm5776_vm5, %v5724_v32, 0.0  ;;  %v6308_v2 = vld [vmem:[#allocation2 + $0xd1] sm:$0xff]  ;;  %v6310_v51 = vld [vmem:[#allocation2 + $0xe1] sm:$0xff]  ;;  %7263 = vst [vmem:[#allocation65_spill] sm:$0xff] %v6312_v20 }
 0x13e   : > { %v7259_v49 = vsel %vm6297_vm15, 4294967295, %v7258_v49  ;;  %5025 = vmatprep.mubr.msk.bf16.mxu1 %vm7261_vm13, %v5730_v35  ;;  %7262 = vst [vmem:[#allocation64_spill] sm:$0xff] %v6310_v51  ;;  %v6315_v11 = vpack.c.bf16 %v3718_v26, %v6243_v50  ;;  %v6318_v34 = vpack.c.bf16 %v3720_v38, %v6241_v25  ;;  %v6321_v15 = vpack.c.bf16 %v3722_v22, %v6245_v52  ;;  %v6323_v35 = vld [vmem:[#allocation2 + $0xc9] sm:$0xff]  ;;  %v6325_v53 = vld [vmem:[#allocation2 + $0xd9] sm:$0xff]  ;;  %vm7273_vm13 = vmmov %vm7247_vm4 }
 0x13f   : > { %7260 = vst [vmem:[#allocation63_spill] sm:$0xff] %v6301_v30  ;;  %v3724_v32 = vsel %vm6186_vm8, %v6249_v44, 0.0  ;;  %v3726_v3 = vsel %vm6190_vm0, %v6251_v54, 0.0  ;;  %v3728_v26 = vsel %vm6194_vm11, %v6268_v60, 0.0  ;;  %v3730_v38 = vsel %vm6198_vm7, %v6270_v61, 0.0  ;;  %v6339_v22 = vld [vmem:[#allocation2 + $0xe9] sm:$0xff] }
 0x140   : > { %7264 = vst [vmem:[#allocation66_spill] sm:$0xff] %v6315_v11  ;;  %7265 = vst [vmem:[#allocation67_spill] sm:$0xff] %v6318_v34  ;;  %v6343_v34 = vld [vmem:[#allocation2 + $0x111] sm:$0xff]  ;;  %v6346_v11 = vpack.c.bf16 %v3724_v32, %v6247_v24  ;;  %v6349_v30 = vpack.c.bf16 %v3726_v3, %v6285_v36  ;;  %v6352_v54 = vpack.c.bf16 %v3728_v26, %v6266_v42  ;;  %v6359_v61 = vld [vmem:[#allocation2 + $0x109] sm:$0xff]  ;;  %v3732_v48 = vsel %vm6253_vm2, %v6291_v29, 0.0 }
 0x141   : > { %7266 = vst [vmem:[#allocation68_spill] sm:$0xff] %v6321_v15  ;;  %v6341_v15 = vld [vmem:[#allocation2 + $0x101] sm:$0xff]  ;;  %v6355_v60 = vpack.c.bf16 %v3730_v38, %v6287_v46  ;;  %v3734_v32 = vsel %vm6257_vm3, %v6308_v2, 0.0  ;;  %v3736_v3 = vsel %vm6272_vm12, %v6310_v51, 0.0  ;;  %v3738_v26 = vsel %vm6276_vm1, %v6312_v20, 0.0  ;;  %vm7305_vm1 = vmmov %vm7247_vm4 }
 0x142   : > { %7267 = vst [vmem:[#allocation69_spill] sm:$0xff] %v6346_v11  ;;  %7268 = vst [vmem:[#allocation70_spill] sm:$0xff] %v6349_v30  ;;  %v6374_v38 = vpack.c.bf16 %v3732_v48, %v6289_v27  ;;  %v6383_v30 = vpack.c.bf16 %v3738_v26, %v6339_v22  ;;  %v1235_v11 = vpack.c.bf16 %v5748_v47, %v1205_v31  ;;  %vm7271_vm5 = vcmask 1041408   ;;  %v6400_v47 = vld [vmem:[%s7034_s2 + $0xc] sm:$0x3] }
 0x143   : > { %7269 = vst [vmem:[#allocation71_spill] sm:$0xff] %v6352_v54  ;;  %7270 = vst [vmem:[#allocation72_spill] sm:$0xff] %v6355_v60  ;;  %v6377_v60 = vpack.c.bf16 %v3734_v32, %v6323_v35  ;;  %v6380_v54 = vpack.c.bf16 %v3736_v3, %v6325_v53  ;;  %v2866_v51 = vsel %vm7271_vm5, %v6023_v10, 0  ;;  %v3740_v20 = vsel %vm6293_vm14, %v6341_v15, 0.0  ;;  %4924 = vmatmul.mubr.msk.bf16.vlgmr.msra.gmra.mrb[32].mxu0 %vm7247_vm4, %v1234_v40  ;;  %v7302_v3 = vld [vmem:[#allocation32_spill] sm:$0xff]  ;;  %v7304_v26 = vld [vmem:[#allocation38_spill] sm:$0xff] }
 0x144   : > { %v3742_v48 = vsel %vm6297_vm15, %v6343_v34, 0.0  ;;  %vm7272_vm9 = vmmov %vm7271_vm5  ;;  %v6403_v10 = vpack.c.bf16 %v3740_v20, %v6357_v59  ;;  %4927 = vmatprep.mubr.msk.bf16.mxu0 %vm7273_vm13, %v1235_v11  ;;  %vm7275_vm15 = vnez %v7147_v58  ;;  %v7289_v58 = vld [vmem:[#allocation20_spill] sm:$0xff]  ;;  %v7298_v20 = vld [vmem:[#allocation34_spill] sm:$0xff]  ;;  %v1836_v23 = vsel %vm6194_vm11, %v6249_v44, 0.0 }
 0x145   : > { %v1920_v32 = vsel %vm7272_vm9, %v5743_v43, 0  ;;  %v6406_v31 = vpack.c.bf16 %v3742_v48, %v6359_v61  ;;  %vm7274_vm5 = vmmov %vm7247_vm4  ;;  %v1207_v43 = vsel %vm5799_vm6, %v5770_v63, 0.0  ;;  %v1209_v40 = vsel %vm7275_vm15, %v5791_v14, 0.0  ;;  %v1121_v14 = vld [vmem:[#allocation2 + $0x87] sm:$0xff]  ;;  %v7300_v11 = vld [vmem:[#allocation35_spill] sm:$0xff] }
 0x146   : > { %5026 = vmatmul.mubr.msk.bf16.vlgmr.msra.gmra.mrb[16].mxu1 %vm7274_vm5, %v5737_v41  ;;  %4956 = vmatpush3.bf16.msra.mxu0 %v1920_v32  ;;  %vm7276_vm13 = vmmov %vm7272_vm9  ;;  %v1236_v41 = vpack.c.bf16 %v5783_v8, %v1207_v43  ;;  %vm7280_vm15 = vnez %v7149_v6  ;;  %v7306_v48 = vld [vmem:[#allocation39_spill] sm:$0xff]  ;;  %v7308_v32 = vld [vmem:[#allocation41_spill] sm:$0xff]  ;;  %v1844_v9 = vsel %vm6272_vm12, %v6291_v29, 0.0 }
 0x147   : > { %5058 = vmatpush3.bf16.msra.mxu1 %v2866_v51  ;;  %5029 = vmatprep.mubr.msk.bf16.mxu1 %vm7247_vm4, %v5789_v12  ;;  %v1237_v51 = vpack.c.bf16 %v5815_v33, %v1209_v40  ;;  %vm7277_vm5 = vmmov %vm7247_vm4  ;;  %v1211_v63 = vsel %vm7280_vm15, %v5831_v45, 0.0  ;;  %v7287_v33 = vld [vmem:[#allocation21_spill] sm:$0xff]  ;;  %v7310_v43 = vld [vmem:[#allocation40_spill] sm:$0xff] }
 0x148   : > { %5492 = vmatprep.subr.msk.bf16.mxu1 %vm7272_vm9, %v6400_v47  ;;  %5488 = vmatprep.subr.msk.bf16.mxu0 %vm7276_vm13, %v5671_v55  ;;  %vm7278_vm6 = vmmov %vm7247_vm4  ;;  %vm7281_vm13 = vnez %v7156_v16  ;;  %v1238_v8 = vpack.c.bf16 %v5847_v62, %v1211_v63  ;;  %vm7288_vm15 = vnez %v7287_v33  ;;  %v7294_v16 = vld [vmem:[#allocation23_spill] sm:$0xff]  ;;  %v7314_v40 = vld [vmem:[#allocation48_spill] sm:$0xff] }
 0x149   : > { %vm7279_vm9 = vmmov %vm7247_vm4  ;;  %v1213_v55 = vsel %vm7281_vm13, %v5859_v7, 0.0  ;;  %v1215_v45 = vsel %vm7288_vm15, %v7286_v19, 0.0  ;;  %vm7290_vm13 = vnez %v7289_v58  ;;  %v7292_v7 = vld [vmem:[#allocation25_spill] sm:$0xff] }
 0x14a   : > { %v1239_v12 = vpack.c.bf16 %v5879_v37, %v1213_v55  ;;  %v1217_v62 = vsel %vm7290_vm13, %v1121_v14, 0.0  ;;  %vm7299_vm14 = vmmov %vm7247_vm4  ;;  %v2736_v63 = vld [vmem:[#allocation2 + $0x21] sm:$0xff]  ;;  %v1725_v55 = vld [vmem:[#allocation2 + $0x9] sm:$0xff] }
 0x14b   : > { %4928 = vmatmul.mubr.msk.bf16.gmra.mrb[36].mxu0 %vm7277_vm5, %v1236_v41  ;;  %vm7282_vm5 = vmmov %vm7247_vm4  ;;  %v1241_v37 = vpack.c.bf16 %v7292_v7, %v1217_v62  ;;  %v7316_v41 = vld [vmem:[#allocation44_spill] sm:$0xff]  ;;  %v2472_v14 = vld [vmem:[#allocation2 + $0x110] sm:$0xff] }
 0x14c   : > { %4931 = vmatprep.mubr.msk.bf16.mxu0 %vm7247_vm4, %v1237_v51  ;;  %vm7301_vm15 = vmmov %vm7247_vm4  ;;  %v1726_v51 = vld [vmem:[#allocation2 + $0x11] sm:$0xff] }
 0x14d   : > { %vm7303_vm13 = vmmov %vm7247_vm4  ;;  %v7326_v7 = vld [vmem:[#allocation43_spill] sm:$0xff] }
 0x14e   : > { %5030 = vmatmul.mubr.msk.bf16.gmra.mrb[20].mxu1 %vm7278_vm6, %v5797_v18  ;;  %vm7283_vm6 = vmmov %vm7247_vm4  ;;  %v7284_v18 = vld [vmem:[#allocation19_spill] sm:$0xff] }
 0x14f   : > { %5033 = vmatprep.mubr.msk.bf16.mxu1 %vm7279_vm9, %v5853_v4  ;;  %vm7285_vm9 = vmmov %vm7247_vm4  ;;  %v7291_v4 = vld [vmem:[#allocation18_spill] sm:$0xff] }
 0x150   : > { %v1240_v6 = vpack.c.bf16 %v7291_v4, %v1215_v45 }
 0x153   : > { %4932 = vmatmul.mubr.msk.bf16.gmra.mrb[40].mxu0 %vm7282_vm5, %v1238_v8  ;;  %vm7293_vm5 = vmmov %vm7247_vm4 }
 0x154   : > { %4935 = vmatprep.mubr.msk.bf16.mxu0 %vm7247_vm4, %v1239_v12  ;;  %v1822_v12 = vsel %vm5909_vm10, %v1726_v51, 0.0  ;;  %v7337_v51 = vld [vmem:[#allocation3_spill] sm:$0xff] }
 0x155   : > { %v1853_v19 = vpack.c.bf16 %v1822_v12, %v1725_v55  ;;  %v7340_v55 = vld [vmem:[#allocation49_spill] sm:$0xff] }
 0x156   : > { %5034 = vmatmul.mubr.msk.bf16.gmra.mrb[24].mxu1 %vm7283_vm6, %v5866_v17  ;;  %vm7295_vm6 = vmmov %vm7247_vm4  ;;  %v7296_v17 = vld [vmem:[#allocation33_spill] sm:$0xff] }
 0x157   : > { %5037 = vmatprep.mubr.msk.bf16.mxu1 %vm7285_vm9, %v7284_v18  ;;  %vm7297_vm9 = vmmov %vm7247_vm4  ;;  %v2471_v18 = vld [vmem:[#allocation2 + $0x108] sm:$0xff] }
 0x158   : > { %v6486_v45 = vpack.c.bf16 %v2472_v14, %v2471_v18  ;;  %v7342_v14 = vld [vmem:[#allocation51_spill] sm:$0xff] }
 0x15b   : > { %4936 = vmatmul.mubr.msk.bf16.gmra.mrb[44].mxu0 %vm7293_vm5, %v1240_v6  ;;  %vm7307_vm5 = vmmov %vm7305_vm1  ;;  %v7325_v6 = vld [vmem:[#allocation27_spill] sm:$0xff] }
 0x15c   : > { %4939 = vmatprep.mubr.msk.bf16.mxu0 %vm7247_vm4, %v1241_v37  ;;  %vm7309_vm4 = vmmov %vm7305_vm1 }
 0x15e   : > { %5038 = vmatmul.mubr.msk.bf16.gmra.mrb[28].mxu1 %vm7295_vm6, %v7294_v16  ;;  %vm7311_vm6 = vmmov %vm7305_vm1 }
 0x15f   : > { %5041 = vmatprep.mubr.msk.bf16.mxu1 %vm7297_vm9, %v7296_v17  ;;  %vm7317_vm9 = vmmov %vm7305_vm1 }
 0x163   : > { %4940 = vmatmul.mubr.msk.bf16.gmra.mrb[48].mxu0 %vm7299_vm14, %v7298_v20  ;;  %vm7312_vm14 = vmmov %vm7305_vm1 }
 0x164   : > { %4943 = vmatprep.mubr.msk.bf16.mxu0 %vm7301_vm15, %v7300_v11  ;;  %vm7313_vm15 = vmmov %vm7305_vm1  ;;  %v7329_v11 = vld [vmem:[#allocation54_spill] sm:$0xff] }
 0x166   : > { %5042 = vmatmul.mubr.msk.bf16.gmra.mrb[0].mxu1 %vm7303_vm13, %v7302_v3  ;;  %vm7315_vm13 = vmmov %vm7305_vm1 }
 0x167   : > { %5045 = vmatprep.mubr.msk.bf16.mxu1 %vm7305_vm1, %v7304_v26 }
 0x16b   : > { %4944 = vmatmul.mubr.msk.bf16.gmra.mrb[52].mxu0 %vm7307_vm5, %v7306_v48  ;;  %vm7319_vm5 = vmmov %vm7305_vm1 }
 0x16c   : > { %4947 = vmatprep.mubr.msk.bf16.mxu0 %vm7309_vm4, %v7308_v32  ;;  %vm7320_vm4 = vmmov %vm7305_vm1  ;;  %v7331_v32 = vld [vmem:[#allocation45_spill] sm:$0xff] }
 0x16e   : > { %5046 = vmatmul.mubr.msk.bf16.gmra.mrb[4].mxu1 %vm7311_vm6, %v7310_v43  ;;  %vm7321_vm6 = vmmov %vm7305_vm1 }
 0x16f   : > { %5049 = vmatprep.mubr.msk.bf16.mxu1 %vm7312_vm14, %v6133_v57  ;;  %v2735_v57 = vld [vmem:[#allocation2 + $0x19] sm:$0xff]  ;;  %vm7322_vm14 = vmmov %vm7305_vm1 }
 0x173   : > { %4948 = vmatmul.mubr.msk.bf16.gmra.mrb[56].mxu0 %vm7313_vm15, %v6137_v0  ;;  %v2768_v0 = vsel %vm5909_vm10, %v2736_v63, 0.0  ;;  %vm7327_vm10 = vnez %v7326_v7  ;;  %v2780_v7 = vsel %vm6190_vm0, %v6249_v44, 0.0 }
 0x174   : > { %4951 = vmatprep.mubr.msk.bf16.mxu0 %vm7315_vm13, %v7314_v40  ;;  %v2799_v62 = vpack.c.bf16 %v2768_v0, %v2735_v57  ;;  %v1826_v37 = vsel %vm7327_vm10, %v7325_v6, 0.0  ;;  %vm7330_vm13 = vcmask 1041408   ;;  %v6514_v40 = vld [vmem:[%s7034_s2 + $0xe] sm:$0x3] }
 0x175   : > { %v1855_v3 = vpack.c.bf16 %v1826_v37, %v7329_v11  ;;  %v3192_v48 = vsel %vm7330_vm13, %v6400_v47, 0 }
 0x176   : > { %5050 = vmatmul.mubr.msk.bf16.gmra.mrb[8].mxu1 %vm7305_vm1, %v7316_v41  ;;  %v7335_v41 = vld [vmem:[#allocation47_spill] sm:$0xff] }
 0x177   : > { %5053 = vmatprep.mubr.msk.bf16.mxu1 %vm7317_vm9, %v6235_v28  ;;  %v7323_v28 = vld [vmem:[#allocation42_spill] sm:$0xff]  ;;  %vm7332_vm9 = vmmov %vm7305_vm1 }
 0x178   : > { %vm7324_vm15 = vnez %v7323_v28  ;;  %v1832_v28 = vsel %vm6186_vm8, %v7342_v14, 0.0 }
 0x179   : > { %v1824_v4 = vsel %vm7324_vm15, %v2736_v63, 0.0  ;;  %v2770_v16 = vsel %vm7324_vm15, %v7325_v6, 0.0  ;;  %v7339_v63 = vld [vmem:[#allocation50_spill] sm:$0xff]  ;;  %vm7341_vm15 = vnez %v7340_v55  ;;  %v1858_v37 = vpack.c.bf16 %v1832_v28, %v6241_v25 }
 0x17a   : > { %v1854_v20 = vpack.c.bf16 %v1824_v4, %v2735_v57  ;;  %v2800_v26 = vpack.c.bf16 %v2770_v16, %v7329_v11  ;;  %v1830_v8 = vsel %vm7341_vm15, %v7339_v63, 0.0  ;;  %v2776_v57 = vsel %vm7341_vm15, %v7342_v14, 0.0  ;;  %v7346_v4 = vld [vmem:[#allocation52_spill] sm:$0xff] }
 0x17b   : > { %4952 = vmatmul.mubr.msk.bf16.gmra.mrb[60].mxu0 %vm7319_vm5, %v6239_v1  ;;  %v7328_v1 = vld [vmem:[#allocation46_spill] sm:$0xff]  ;;  %vm7333_vm5 = vmmov %vm7305_vm1  ;;  %v1857_v18 = vpack.c.bf16 %v1830_v8, %v6243_v50  ;;  %v1834_v6 = vsel %vm6190_vm0, %v7346_v4, 0.0 }
 0x17c   : > { %4957 = vmatprep.mubr.msk.bf16.mxu0 %vm7320_vm4, %v1853_v19  ;;  %v2772_v17 = vsel %vm7327_vm10, %v7328_v1, 0.0  ;;  %vm7334_vm4 = vmmov %vm7305_vm1  ;;  %v1859_v16 = vpack.c.bf16 %v1834_v6, %v6245_v52 }
 0x17d   : > { %v2801_v43 = vpack.c.bf16 %v2772_v17, %v7331_v32  ;;  %vm7343_vm10 = vmmov %vm7305_vm1  ;;  %v2805_v17 = vpack.c.bf16 %v2780_v7, %v6247_v24 }
 0x17e   : > { %5054 = vmatmul.mubr.msk.bf16.gmra.mrb[12].mxu1 %vm7321_vm6, %v6486_v45  ;;  %vm7336_vm6 = vnez %v7335_v41  ;;  %vm7356_vm0 = vmmov %vm7305_vm1 }
 0x17f   : > { %5059 = vmatprep.mubr.msk.bf16.mxu1 %vm7322_vm14, %v2799_v62  ;;  %v1828_v47 = vsel %vm7336_vm6, %v7328_v1, 0.0  ;;  %vm7338_vm14 = vmmov %vm7330_vm13  ;;  %v2774_v12 = vsel %vm7336_vm6, %v7339_v63, 0.0  ;;  %v2803_v62 = vpack.c.bf16 %v2776_v57, %v6241_v25  ;;  %v1864_v57 = vpack.c.bf16 %v1844_v9, %v6289_v27  ;;  %v7400_v25 = vld [vmem:[#allocation14_spill] sm:$0xff]  ;;  %v7420_v9 = vld [vmem:[#allocation29_spill] sm:$0xff] }
 0x180   : > { %v1856_v0 = vpack.c.bf16 %v1828_v47, %v7331_v32  ;;  %v2802_v19 = vpack.c.bf16 %v2774_v12, %v6243_v50  ;;  %vm7344_vm13 = vmmov %vm7305_vm1  ;;  %v2778_v50 = vsel %vm6186_vm8, %v7346_v4, 0.0  ;;  %v7359_v47 = vld [vmem:[#allocation62_spill] sm:$0xff] }
 0x181   : > { %v2804_v1 = vpack.c.bf16 %v2778_v50, %v6245_v52  ;;  %vm7349_vm6 = vmmov %vm7305_vm1 }
 0x182   : > { %vm7355_vm8 = vmmov %vm7305_vm1 }
 0x183   : > { %4958 = vmatmul.mubr.msk.bf16.vlgmr.msra.gmra.mrb[32].mxu0 %vm7305_vm1, %v1854_v20  ;;  %v7352_v20 = vld [vmem:[#allocation59_spill] sm:$0xff]  ;;  %vm7357_vm15 = vmmov %vm7356_vm0 }
 0x184   : > { %4961 = vmatprep.mubr.msk.bf16.mxu0 %vm7332_vm9, %v1855_v3  ;;  %4990 = vmatpush3.bf16.msra.mxu0 %v7337_v51  ;;  %vm7345_vm9 = vmmov %vm7305_vm1  ;;  %v1838_v11 = vsel %vm6198_vm7, %v7352_v20, 0.0  ;;  %v2782_v52 = vsel %vm6194_vm11, %v7352_v20, 0.0  ;;  %v7354_v3 = vld [vmem:[#allocation61_spill] sm:$0xff]  ;;  %v2788_v51 = vsel %vm6257_vm3, %v6291_v29, 0.0 }
 0x185   : > { %v1861_v32 = vpack.c.bf16 %v1838_v11, %v6285_v36  ;;  %v1840_v41 = vsel %vm6253_vm2, %v7354_v3, 0.0  ;;  %v2809_v12 = vpack.c.bf16 %v2788_v51, %v6289_v27  ;;  %vm7361_vm11 = vmmov %vm7356_vm0  ;;  %v7399_v20 = vld [vmem:[#allocation13_spill] sm:$0xff]  ;;  %v7402_v11 = vld [vmem:[#allocation16_spill] sm:$0xff] }
 0x186   : > { %5060 = vmatmul.mubr.msk.bf16.vlgmr.msra.gmra.mrb[16].mxu1 %vm7333_vm5, %v2800_v26  ;;  %vm7347_vm5 = vmmov %vm7305_vm1  ;;  %v2784_v26 = vsel %vm6198_vm7, %v7354_v3, 0.0  ;;  %v1862_v63 = vpack.c.bf16 %v1840_v41, %v6266_v42  ;;  %v7406_v3 = vld [vmem:[#allocation26_spill] sm:$0xff] }
 0x187   : > { %5092 = vmatpush3.bf16.msra.mxu1 %v3192_v48  ;;  %5063 = vmatprep.mubr.msk.bf16.mxu1 %vm7334_vm4, %v2801_v43  ;;  %vm7348_vm4 = vmmov %vm7305_vm1  ;;  %v1860_v48 = vpack.c.bf16 %v1836_v23, %v6247_v24  ;;  %v2806_v43 = vpack.c.bf16 %v2782_v52, %v6285_v36  ;;  %v2807_v44 = vpack.c.bf16 %v2784_v26, %v6266_v42  ;;  %v1842_v24 = vsel %vm6257_vm3, %v7359_v47, 0.0  ;;  %v7365_v42 = vld [vmem:[#allocation64_spill] sm:$0xff]  ;;  %v7404_v52 = vld [vmem:[#allocation22_spill] sm:$0xff] }
 0x188   : > { %5493 = vmatprep.subr.msk.bf16.mxu1 %vm7338_vm14, %v6514_v40  ;;  %vm7350_vm14 = vmmov %vm7305_vm1  ;;  %v2786_v36 = vsel %vm6253_vm2, %v7359_v47, 0.0  ;;  %v1863_v55 = vpack.c.bf16 %v1842_v24, %v6287_v46  ;;  %vm7364_vm2 = vnez %v7254_v21  ;;  %v7372_v21 = vld [vmem:[#allocation65_spill] sm:$0xff]  ;;  %v7397_v23 = vld [vmem:[#allocation12_spill] sm:$0xff] }
 0x189   : > { %v2808_v8 = vpack.c.bf16 %v2786_v36, %v6287_v46  ;;  %vm7360_vm7 = vmmov %vm7356_vm0  ;;  %v1846_v5 = vsel %vm7364_vm2, %v6308_v2, 0.0  ;;  %v2790_v46 = vsel %vm6272_vm12, %v6308_v2, 0.0  ;;  %v2792_v14 = vsel %vm7364_vm2, %v7365_v42, 0.0  ;;  %v3075_v26 = vld [vmem:[#allocation2 + $0x97] sm:$0xff]  ;;  %v3078_v41 = vld [vmem:[#allocation2 + $0xaf] sm:$0xff] }
 0x18a   : > { %vm7366_vm3 = vmmov %vm7356_vm0  ;;  %v2811_v29 = vpack.c.bf16 %v2792_v14, %v6325_v53  ;;  %vm7385_vm2 = vcmask 1041408   ;;  %v7411_v47 = vld [vmem:[#allocation30_spill] sm:$0xff]  ;;  %v7414_v24 = vld [vmem:[#allocation31_spill] sm:$0xff] }
 0x18b   : > { %4962 = vmatmul.mubr.msk.bf16.gmra.mrb[36].mxu0 %vm7343_vm10, %v1856_v0  ;;  %vm7358_vm10 = vmmov %vm7356_vm0  ;;  %v1865_v0 = vpack.c.bf16 %v1846_v5, %v6323_v35 }
 0x18c   : > { %4965 = vmatprep.mubr.msk.bf16.mxu0 %vm7344_vm13, %v1857_v18  ;;  %vm7362_vm13 = vmmov %vm7356_vm0  ;;  %v2810_v18 = vpack.c.bf16 %v2790_v46, %v6323_v35 }
 0x18d   : > { %vm7370_vm12 = vmmov %vm7356_vm0 }
 0x18e   : > { %5064 = vmatmul.mubr.msk.bf16.gmra.mrb[20].mxu1 %vm7305_vm1, %v2802_v19  ;;  %vm7363_vm1 = vmmov %vm7356_vm0  ;;  %v7367_v19 = vld [vmem:[#allocation4_spill] sm:$0xff] }
 0x18f   : > { %5067 = vmatprep.mubr.msk.bf16.mxu1 %vm7345_vm9, %v2803_v62  ;;  %v656_v62 = vadd.s32 248, %v7367_v19  ;;  %vm7368_vm9 = vmmov %vm7356_vm0  ;;  %v7426_v19 = vld [vmem:[#allocation37_spill] sm:$0xff] }
 0x191   : > { %v878_v35 = vand.u32 15, %v656_v62 }
 0x193   : > { %4966 = vmatmul.mubr.msk.bf16.gmra.mrb[40].mxu0 %vm7347_vm5, %v1858_v37  ;;  %vm7369_vm5 = vmmov %vm7356_vm0 }
 0x194   : > { %4969 = vmatprep.mubr.msk.bf16.mxu0 %vm7348_vm4, %v1859_v16  ;;  %vm7371_vm4 = vnez %v7257_v13  ;;  %v7380_v16 = vld [vmem:[#allocation5_spill] sm:$0xff] }
 0x195   : > { %v1848_v56 = vsel %vm7371_vm4, %v7365_v42, 0.0  ;;  %v2794_v2 = vsel %vm7371_vm4, %v7372_v21, 0.0  ;;  %vm7394_vm4 = vmmov %vm7385_vm2  ;;  %v3082_v42 = vld [vmem:[#allocation2 + $0xcf] sm:$0xff] }
 0x196   : > { %5068 = vmatmul.mubr.msk.bf16.gmra.mrb[24].mxu1 %vm7349_vm6, %v2804_v1  ;;  %vm7373_vm6 = vnez %v7259_v49  ;;  %v1866_v4 = vpack.c.bf16 %v1848_v56, %v6325_v53  ;;  %v2812_v50 = vpack.c.bf16 %v2794_v2, %v6339_v22  ;;  %v7383_v1 = vld [vmem:[#allocation6_spill] sm:$0xff]  ;;  %v7430_v2 = vld [vmem:[#allocation60_spill] sm:$0xff] }
 0x197   : > { %5071 = vmatprep.mubr.msk.bf16.mxu1 %vm7350_vm14, %v2805_v17  ;;  %v1850_v27 = vsel %vm7373_vm6, %v7372_v21, 0.0  ;;  %v2796_v28 = vsel %vm7373_vm6, %v6341_v15, 0.0  ;;  %vm7374_vm14 = vmmov %vm7356_vm0  ;;  %v7386_v17 = vld [vmem:[#allocation7_spill] sm:$0xff] }
 0x198   : > { %v1867_v6 = vpack.c.bf16 %v1850_v27, %v6339_v22  ;;  %v2813_v7 = vpack.c.bf16 %v2796_v28, %v6357_v59  ;;  %vm7396_vm6 = vmmov %vm7356_vm0  ;;  %v3086_v21 = vld [vmem:[#allocation2 + $0xef] sm:$0xff] }
 0x199   : > { %v7432_v28 = vld [vmem:[#allocation63_spill] sm:$0xff] }
 0x19b   : > { %4970 = vmatmul.mubr.msk.bf16.gmra.mrb[44].mxu0 %vm7355_vm8, %v1860_v48  ;;  %vm6640_vm8 = vcmp.ne.s32.totalorder %v878_v35, 15  ;;  %v7408_v48 = vld [vmem:[#allocation28_spill] sm:$0xff] }
 0x19c   : > { %4973 = vmatprep.mubr.msk.bf16.mxu0 %vm7356_vm0, %v1861_v32  ;;  %v1852_v13 = vsel %vm6640_vm8, %v6341_v15, 0.0  ;;  %v2798_v49 = vsel %vm6640_vm8, %v6343_v34, 0.0  ;;  %v3486_v15 = vsel %vm7385_vm2, %v6514_v40, 0  ;;  %v7390_v34 = vld [vmem:[#allocation9_spill] sm:$0xff]  ;;  %v7395_v40 = vld [vmem:[#allocation11_spill] sm:$0xff]  ;;  %vm7412_vm2 = vmmov %vm7356_vm0 }
 0x19d   : > { %v1868_v53 = vpack.c.bf16 %v1852_v13, %v6357_v59  ;;  %v2814_v22 = vpack.c.bf16 %v2798_v49, %v6359_v61  ;;  %v4627_v59 = vld [vmem:[%s7034_s2 + $0x10] sm:$0x3]  ;;  %v7388_v61 = vld [vmem:[#allocation8_spill] sm:$0xff]  ;;  %v3387_v49 = vld [vmem:[#allocation2 + $0x28] sm:$0xff] }
 0x19e   : > { %5072 = vmatmul.mubr.msk.bf16.gmra.mrb[28].mxu1 %vm7357_vm15, %v2806_v43  ;;  %vm7377_vm15 = vmmov %vm7356_vm0  ;;  %v3076_v32 = vld [vmem:[#allocation2 + $0x9f] sm:$0xff]  ;;  %v3091_v35 = vld [vmem:[#allocation2 + $0x117] sm:$0xff] }
 0x19f   : > { %5075 = vmatprep.mubr.msk.bf16.mxu1 %vm7358_vm10, %v2807_v44  ;;  %vm7378_vm10 = vmmov %vm7356_vm0 }
 0x1a3   : > { %4974 = vmatmul.mubr.msk.bf16.gmra.mrb[48].mxu0 %vm7360_vm7, %v1862_v63  ;;  %vm7379_vm7 = vmmov %vm7356_vm0  ;;  %v3079_v63 = vld [vmem:[#allocation2 + $0xb7] sm:$0xff] }
 0x1a4   : > { %4977 = vmatprep.mubr.msk.bf16.mxu0 %vm7361_vm11, %v1863_v55  ;;  %vm7381_vm11 = vmmov %vm7356_vm0  ;;  %v3081_v55 = vld [vmem:[#allocation2 + $0xc7] sm:$0xff] }
 0x1a6   : > { %5076 = vmatmul.mubr.msk.bf16.gmra.mrb[0].mxu1 %vm7362_vm13, %v2808_v8  ;;  %vm7382_vm13 = vmmov %vm7356_vm0  ;;  %v3080_v8 = vld [vmem:[#allocation2 + $0xbf] sm:$0xff] }
 0x1a7   : > { %5079 = vmatprep.mubr.msk.bf16.mxu1 %vm7363_vm1, %v2809_v12  ;;  %vm7384_vm1 = vmmov %vm7356_vm0  ;;  %v7418_v12 = vld [vmem:[#allocation24_spill] sm:$0xff] }
 0x1ab   : > { %4978 = vmatmul.mubr.msk.bf16.gmra.mrb[52].mxu0 %vm7366_vm3, %v1864_v57  ;;  %vm7387_vm3 = vmmov %vm7356_vm0  ;;  %v3085_v57 = vld [vmem:[#allocation2 + $0xe7] sm:$0xff] }
 0x1ac   : > { %4981 = vmatprep.mubr.msk.bf16.mxu0 %vm7368_vm9, %v1865_v0  ;;  %vm7389_vm9 = vmmov %vm7356_vm0  ;;  %v3084_v0 = vld [vmem:[#allocation2 + $0xdf] sm:$0xff] }
 0x1ae   : > { %5080 = vmatmul.mubr.msk.bf16.gmra.mrb[4].mxu1 %vm7369_vm5, %v2810_v18  ;;  %vm7391_vm5 = vmmov %vm7356_vm0  ;;  %v7424_v18 = vld [vmem:[#allocation36_spill] sm:$0xff] }
 0x1af   : > { %5083 = vmatprep.mubr.msk.bf16.mxu1 %vm7370_vm12, %v2811_v29  ;;  %vm7393_vm12 = vmmov %vm7356_vm0 }
 0x1b3   : > { %4982 = vmatmul.mubr.msk.bf16.gmra.mrb[56].mxu0 %vm7374_vm14, %v1866_v4  ;;  %vm7398_vm14 = vmmov %vm7356_vm0  ;;  %v3092_v4 = vld [vmem:[#allocation2 + $0x11f] sm:$0xff] }
 0x1b4   : > { %4985 = vmatprep.mubr.msk.bf16.mxu0 %vm7356_vm0, %v1867_v6  ;;  %v7434_v6 = vld [vmem:[#allocation53_spill] sm:$0xff] }
 0x1b6   : > { %5084 = vmatmul.mubr.msk.bf16.gmra.mrb[8].mxu1 %vm7377_vm15, %v2812_v50  ;;  %vm7401_vm15 = vmmov %vm7356_vm0 }
 0x1b7   : > { %5087 = vmatprep.mubr.msk.bf16.mxu1 %vm7378_vm10, %v2813_v7  ;;  %vm7403_vm10 = vmmov %vm7356_vm0  ;;  %v3388_v7 = vld [vmem:[#allocation2 + $0x30] sm:$0xff] }
 0x1bb   : > { %4986 = vmatmul.mubr.msk.bf16.gmra.mrb[60].mxu0 %vm7379_vm7, %v1868_v53  ;;  %vm7405_vm7 = vmmov %vm7356_vm0  ;;  %v3419_v53 = vpack.c.bf16 %v3388_v7, %v3387_v49  ;;  %v7470_v7 = vld [vmem:[#allocation72_spill] sm:$0xff] }
 0x1bc   : > { %4991 = vmatprep.mubr.msk.bf16.mxu0 %vm7381_vm11, %v7380_v16  ;;  %vm7407_vm11 = vmmov %vm7356_vm0  ;;  %v3392_v16 = vld [vmem:[#allocation2 + $0x50] sm:$0xff]  ;;  %v3711_v49 = vld [vmem:[#allocation2 + $0x119] sm:$0xff] }
 0x1be   : > { %5088 = vmatmul.mubr.msk.bf16.gmra.mrb[12].mxu1 %vm7382_vm13, %v2814_v22  ;;  %vm7409_vm13 = vmmov %vm7356_vm0  ;;  %v3390_v22 = vld [vmem:[#allocation2 + $0x40] sm:$0xff] }
 0x1bf   : > { %5093 = vmatprep.mubr.msk.bf16.mxu1 %vm7384_vm1, %v7383_v1  ;;  %vm7410_vm1 = vnez %v7287_v33  ;;  %v3389_v1 = vld [vmem:[#allocation2 + $0x38] sm:$0xff] }
 0x1c0   : > { %v3107_v43 = vsel %vm7410_vm1, %v3075_v26, 0.0  ;;  %vm7435_vm1 = vnez %v7434_v6  ;;  %v7466_v6 = vld [vmem:[#allocation70_spill] sm:$0xff] }
 0x1c1   : > { %v3132_v44 = vpack.c.bf16 %v3076_v32, %v3107_v43  ;;  %v3123_v50 = vsel %vm7435_vm1, %v3091_v35, 0.0  ;;  %v3402_v43 = vld [vmem:[#allocation2 + $0xa0] sm:$0xff]  ;;  %v7459_v35 = vld [vmem:[#allocation66_spill] sm:$0xff] }
 0x1c2   : > { %v3140_v13 = vpack.c.bf16 %v3092_v4, %v3123_v50  ;;  %v7462_v4 = vld [vmem:[#allocation68_spill] sm:$0xff]  ;;  %v7468_v50 = vld [vmem:[#allocation71_spill] sm:$0xff] }
 0x1c3   : > { %4992 = vmatmul.mubr.msk.bf16.vlgmr.msra.gmra.mrb[32].mxu0 %vm7387_vm3, %v7386_v17  ;;  %vm7413_vm3 = vnez %v7289_v58  ;;  %v3083_v58 = vld [vmem:[#allocation2 + $0xd7] sm:$0xff] }
 0x1c4   : > { %4995 = vmatprep.mubr.msk.bf16.mxu0 %vm7389_vm9, %v7388_v61  ;;  %v7415_v36 = vsel %vm7413_vm3, %v7414_v24, 0.0  ;;  %vm7416_vm9 = vmmov %vm7356_vm0  ;;  %v3391_v61 = vld [vmem:[#allocation2 + $0x48] sm:$0xff] }
 0x1c5   : > { %v3133_v51 = vpack.c.bf16 %v3078_v41, %v7415_v36  ;;  %vm7436_vm3 = vmmov %vm7412_vm2  ;;  %v3401_v41 = vld [vmem:[#allocation2 + $0x98] sm:$0xff]  ;;  %v3403_v24 = vld [vmem:[#allocation2 + $0xa8] sm:$0xff] }
 0x1c6   : > { %5094 = vmatmul.mubr.msk.bf16.vlgmr.msra.gmra.mrb[16].mxu1 %vm7391_vm5, %v7390_v34  ;;  %vm7417_vm5 = vmmov %vm7356_vm0  ;;  %v3421_v34 = vpack.c.bf16 %v3392_v16, %v3391_v61 }
 0x1c7   : > { %5126 = vmatpush3.bf16.msra.mxu1 %v3486_v15  ;;  %5097 = vmatprep.mubr.msk.bf16.mxu1 %vm7393_vm12, %v7392_v39  ;;  %vm7419_vm12 = vnez %v7418_v12  ;;  %v3420_v15 = vpack.c.bf16 %v3390_v22, %v3389_v1  ;;  %v3394_v39 = vld [vmem:[#allocation2 + $0x60] sm:$0xff]  ;;  %v3407_v12 = vld [vmem:[#allocation2 + $0xc8] sm:$0xff] }
 0x1c8   : > { %5494 = vmatprep.subr.msk.bf16.mxu1 %vm7394_vm4, %v4627_v59  ;;  %v3111_v33 = vsel %vm7419_vm12, %v3079_v63, 0.0  ;;  %vm7421_vm4 = vnez %v7420_v9  ;;  %vm7439_vm12 = vmmov %vm7412_vm2  ;;  %v3408_v63 = vld [vmem:[#allocation2 + $0xd0] sm:$0xff]  ;;  %v3410_v9 = vld [vmem:[#allocation2 + $0xe0] sm:$0xff] }
 0x1c9   : > { %v3113_v5 = vsel %vm7421_vm4, %v3081_v55, 0.0  ;;  %v3134_v46 = vpack.c.bf16 %v3080_v8, %v3111_v33  ;;  %vm7440_vm4 = vmmov %vm7412_vm2  ;;  %v3405_v55 = vld [vmem:[#allocation2 + $0xb8] sm:$0xff]  ;;  %v3429_v33 = vpack.c.bf16 %v3408_v63, %v3407_v12 }
 0x1ca   : > { %v3135_v14 = vpack.c.bf16 %v3082_v42, %v3113_v5  ;;  %v3412_v5 = vld [vmem:[#allocation2 + $0xf0] sm:$0xff] }
 0x1cb   : > { %4996 = vmatmul.mubr.msk.bf16.gmra.mrb[36].mxu0 %vm7396_vm6, %v7395_v40  ;;  %vm7422_vm6 = vmmov %vm7356_vm0  ;;  %v3396_v40 = vld [vmem:[#allocation2 + $0x70] sm:$0xff] }
 0x1cc   : > { %4999 = vmatprep.mubr.msk.bf16.mxu0 %vm7398_vm14, %v7397_v23  ;;  %vm7423_vm14 = vmmov %vm7356_vm0  ;;  %v3393_v23 = vld [vmem:[#allocation2 + $0x58] sm:$0xff] }
 0x1ce   : > { %5098 = vmatmul.mubr.msk.bf16.gmra.mrb[20].mxu1 %vm7356_vm0, %v7399_v20  ;;  %vm7425_vm0 = vnez %v7424_v18  ;;  %v3422_v20 = vpack.c.bf16 %v3394_v39, %v3393_v23  ;;  %v4094_v18 = vld [vmem:[%s7035_s3] sm:$0x3] }
 0x1cf   : > { %5101 = vmatprep.mubr.msk.bf16.mxu1 %vm7401_vm15, %v7400_v25  ;;  %v3115_v29 = vsel %vm7425_vm0, %v3083_v58, 0.0  ;;  %vm7427_vm15 = vnez %v7426_v19  ;;  %v3395_v25 = vld [vmem:[#allocation2 + $0x68] sm:$0xff]  ;;  %vm7443_vm0 = vmmov %vm7412_vm2 }
 0x1d0   : > { %v3117_v62 = vsel %vm7427_vm15, %v3085_v57, 0.0  ;;  %v3136_v56 = vpack.c.bf16 %v3084_v0, %v3115_v29  ;;  %vm7444_vm15 = vmmov %vm7443_vm0  ;;  %v3414_v57 = vld [vmem:[#allocation2 + $0x100] sm:$0xff]  ;;  %v3413_v0 = vld [vmem:[#allocation2 + $0xf8] sm:$0xff] }
 0x1d1   : > { %v3137_v27 = vpack.c.bf16 %v3086_v21, %v3117_v62  ;;  %vm7449_vm1 = vmmov %vm7443_vm0  ;;  %v3432_v29 = vpack.c.bf16 %v3414_v57, %v3413_v0  ;;  %v3417_v62 = vld [vmem:[#allocation2 + $0x118] sm:$0xff] }
 0x1d3   : > { %5000 = vmatmul.mubr.msk.bf16.gmra.mrb[40].mxu0 %vm7403_vm10, %v7402_v11  ;;  %vm7428_vm10 = vmmov %vm7412_vm2  ;;  %v3423_v11 = vpack.c.bf16 %v3396_v40, %v3395_v25 }
 0x1d4   : > { %5003 = vmatprep.mubr.msk.bf16.mxu0 %vm7405_vm7, %v7404_v52  ;;  %vm7429_vm7 = vmmov %vm7412_vm2  ;;  %v3398_v52 = vld [vmem:[#allocation2 + $0x80] sm:$0xff] }
 0x1d6   : > { %5102 = vmatmul.mubr.msk.bf16.gmra.mrb[24].mxu1 %vm7407_vm11, %v7406_v3  ;;  %vm7431_vm11 = vmmov %vm7412_vm2  ;;  %v3400_v3 = vld [vmem:[#allocation2 + $0x90] sm:$0xff] }
 0x1d7   : > { %5105 = vmatprep.mubr.msk.bf16.mxu1 %vm7409_vm13, %v7408_v48  ;;  %vm7433_vm13 = vmmov %vm7412_vm2  ;;  %v3399_v48 = vld [vmem:[#allocation2 + $0x88] sm:$0xff] }
 0x1d8   : > { %v3425_v32 = vpack.c.bf16 %v3400_v3, %v3399_v48 }
 0x1db   : > { %5004 = vmatmul.mubr.msk.bf16.gmra.mrb[44].mxu0 %vm7412_vm2, %v7411_v47  ;;  %v3426_v47 = vpack.c.bf16 %v3402_v43, %v3401_v41 }
 0x1de   : > { %5106 = vmatmul.mubr.msk.bf16.gmra.mrb[28].mxu1 %vm7416_vm9, %v3132_v44  ;;  %vm7437_vm9 = vcmask 1041408   ;;  %v3404_v44 = vld [vmem:[#allocation2 + $0xb0] sm:$0xff] }
 0x1df   : > { %5109 = vmatprep.mubr.msk.bf16.mxu1 %vm7417_vm5, %v3133_v51  ;;  %v3812_v17 = vsel %vm7437_vm9, %v4627_v59, 0  ;;  %vm7438_vm5 = vmmov %vm7412_vm2  ;;  %v3397_v59 = vld [vmem:[#allocation2 + $0x78] sm:$0xff]  ;;  %v3427_v36 = vpack.c.bf16 %v3404_v44, %v3403_v24  ;;  %v3406_v51 = vld [vmem:[#allocation2 + $0xc0] sm:$0xff] }
 0x1e0   : > { %v3424_v26 = vpack.c.bf16 %v3398_v52, %v3397_v59  ;;  %v3428_v8 = vpack.c.bf16 %v3406_v51, %v3405_v55  ;;  %v6819_v55 = vld [vmem:[%s7037_s5] ss:$0 sm:$0xff] }
 0x1e6   : > { %5110 = vmatmul.mubr.msk.bf16.gmra.mrb[0].mxu1 %vm7422_vm6, %v3134_v46  ;;  %vm7441_vm6 = vmmov %vm7412_vm2  ;;  %v3409_v46 = vld [vmem:[#allocation2 + $0xd8] sm:$0xff] }
 0x1e7   : > { %5113 = vmatprep.mubr.msk.bf16.mxu1 %vm7423_vm14, %v3135_v14  ;;  %vm7442_vm14 = vmmov %vm7412_vm2  ;;  %v3430_v42 = vpack.c.bf16 %v3410_v9, %v3409_v46  ;;  %v3411_v14 = vld [vmem:[#allocation2 + $0xe8] sm:$0xff] }
 0x1e8   : > { %v3431_v58 = vpack.c.bf16 %v3412_v5, %v3411_v14 }
 0x1ee   : > { %5114 = vmatmul.mubr.msk.bf16.gmra.mrb[4].mxu1 %vm7428_vm10, %v3136_v56  ;;  %vm7445_vm10 = vmmov %vm7443_vm0  ;;  %v3418_v56 = vld [vmem:[#allocation2 + $0x120] sm:$0xff] }
 0x1ef   : > { %5117 = vmatprep.mubr.msk.bf16.mxu1 %vm7429_vm7, %v3137_v27  ;;  %vm7446_vm7 = vmmov %vm7443_vm0  ;;  %v3434_v21 = vpack.c.bf16 %v3418_v56, %v3417_v62  ;;  %v7455_v27 = vld [vmem:[#allocation57_spill] sm:$0xff] }
 0x1f6   : > { %5118 = vmatmul.mubr.msk.bf16.gmra.mrb[8].mxu1 %vm7431_vm11, %v7430_v2  ;;  %vm7447_vm11 = vmmov %vm7443_vm0  ;;  %v7457_v2 = vld [vmem:[#allocation58_spill] sm:$0xff] }
 0x1f7   : > { %5121 = vmatprep.mubr.msk.bf16.mxu1 %vm7433_vm13, %v7432_v28  ;;  %vm7448_vm13 = vmmov %vm7443_vm0  ;;  %v7461_v28 = vld [vmem:[#allocation67_spill] sm:$0xff] }
 0x1fe   : > { %5122 = vmatmul.mubr.msk.bf16.gmra.mrb[12].mxu1 %vm7412_vm2, %v3140_v13  ;;  %vm7450_vm2 = vmmov %vm7437_vm9  ;;  %v3712_v13 = vld [vmem:[#allocation2 + $0x121] sm:$0xff] }
 0x1ff   : > { %5127 = vmatprep.mubr.msk.bf16.mxu1 %vm7436_vm3, %v3419_v53  ;;  %5495 = vmatprep.subr.msk.bf16.mxu0 %vm7450_vm2, %v4094_v18  ;;  %vm7451_vm3 = vmmov %vm7450_vm2 }
 0x200   : > { %v4151_v19 = vsel %vm7451_vm3, %v4094_v18, 0  ;;  %vm7452_vm9 = vmmov %vm7443_vm0 }
 0x201   : > { %5194 = vmatpush3.bf16.msra.mxu0 %v4151_v19  ;;  %vm7473_vm2 = vmmov %vm7443_vm0 }
 0x202   : > { %vm7474_vm3 = vmmov %vm7443_vm0 }
 0x206   : > { %5128 = vmatmul.mubr.msk.bf16.vlgmr.msra.gmra.mrb[16].mxu1 %vm7438_vm5, %v3420_v15  ;;  %vm7453_vm5 = vmmov %vm7443_vm0 }
 0x207   : > { %5160 = vmatpush3.bf16.msra.mxu1 %v3812_v17  ;;  %5131 = vmatprep.mubr.msk.bf16.mxu1 %vm7439_vm12, %v3421_v34  ;;  %vm7454_vm12 = vmmov %vm7443_vm0 }
 0x20e   : > { %5132 = vmatmul.mubr.msk.bf16.gmra.mrb[20].mxu1 %vm7440_vm4, %v3422_v20  ;;  %vm7456_vm4 = vmmov %vm7443_vm0 }
 0x20f   : > { %5135 = vmatprep.mubr.msk.bf16.mxu1 %vm7441_vm6, %v3423_v11  ;;  %vm7458_vm6 = vmmov %vm7443_vm0 }
 0x216   : > { %5136 = vmatmul.mubr.msk.bf16.gmra.mrb[24].mxu1 %vm7442_vm14, %v3424_v26  ;;  %vm7460_vm14 = vmmov %vm7443_vm0 }
 0x217   : > { %5139 = vmatprep.mubr.msk.bf16.mxu1 %vm7443_vm0, %v3425_v32 }
 0x21e   : > { %5140 = vmatmul.mubr.msk.bf16.gmra.mrb[28].mxu1 %vm7444_vm15, %v3426_v47  ;;  %vm7463_vm15 = vmmov %vm7443_vm0 }
 0x21f   : > { %5143 = vmatprep.mubr.msk.bf16.mxu1 %vm7445_vm10, %v3427_v36  ;;  %vm7465_vm10 = vmmov %vm7443_vm0 }
 0x226   : > { %5144 = vmatmul.mubr.msk.bf16.gmra.mrb[0].mxu1 %vm7446_vm7, %v3428_v8  ;;  %vm7467_vm7 = vmmov %vm7443_vm0 }
 0x227   : > { %5147 = vmatprep.mubr.msk.bf16.mxu1 %vm7447_vm11, %v3429_v33  ;;  %vm7469_vm11 = vmmov %vm7443_vm0 }
 0x22e   : > { %5148 = vmatmul.mubr.msk.bf16.gmra.mrb[4].mxu1 %vm7448_vm13, %v3430_v42  ;;  %vm7471_vm13 = vmmov %vm7443_vm0 }
 0x22f   : > { %5151 = vmatprep.mubr.msk.bf16.mxu1 %vm7449_vm1, %v3431_v58  ;;  %vm7472_vm1 = vmmov %vm7443_vm0 }
 0x236   : > { %5152 = vmatmul.mubr.msk.bf16.gmra.mrb[8].mxu1 %vm7452_vm9, %v3432_v29  ;;  %vm7475_vm9 = vmmov %vm7443_vm0 }
 0x237   : > { %5155 = vmatprep.mubr.msk.bf16.mxu1 %vm7453_vm5, %v6486_v45  ;;  %v7464_v45 = vld [vmem:[#allocation69_spill] sm:$0xff]  ;;  %vm7476_vm5 = vmmov %vm7443_vm0 }
 0x23e   : > { %5156 = vmatmul.mubr.msk.bf16.gmra.mrb[12].mxu1 %vm7454_vm12, %v3434_v21  ;;  %vm7477_vm12 = vmmov %vm7443_vm0 }
 0x23f   : > { %5161 = vmatprep.mubr.msk.bf16.mxu1 %vm7456_vm4, %v7455_v27  ;;  %vm7478_vm4 = vmmov %vm7443_vm0 }
 0x246   : > { %5162 = vmatmul.mubr.msk.bf16.vlgmr.msra.gmra.mrb[16].mxu1 %vm7458_vm6, %v7457_v2  ;;  %vm7480_vm6 = vmmov %vm7443_vm0 }
 0x247   : > { %5165 = vmatprep.mubr.msk.bf16.mxu1 %vm7460_vm14, %v7459_v35  ;;  %vm7481_vm14 = vmmov %vm7443_vm0 }
 0x24e   : > { %5166 = vmatmul.mubr.msk.bf16.gmra.mrb[20].mxu1 %vm7443_vm0, %v7461_v28 }
 0x24f   : > { %5169 = vmatprep.mubr.msk.bf16.mxu1 %vm7463_vm15, %v7462_v4  ;;  %vm7482_vm15 = vmmov %vm7443_vm0 }
 0x256   : > { %5170 = vmatmul.mubr.msk.bf16.gmra.mrb[24].mxu1 %vm7465_vm10, %v7464_v45  ;;  %vm7483_vm10 = vmmov %vm7443_vm0 }
 0x257   : > { %5173 = vmatprep.mubr.msk.bf16.mxu1 %vm7467_vm7, %v7466_v6  ;;  %vm7484_vm7 = vmmov %vm7443_vm0 }
 0x25e   : > { %5174 = vmatmul.mubr.msk.bf16.gmra.mrb[28].mxu1 %vm7469_vm11, %v7468_v50  ;;  %vm7485_vm11 = vmmov %vm7443_vm0 }
 0x25f   : > { %5177 = vmatprep.mubr.msk.bf16.mxu1 %vm7471_vm13, %v7470_v7  ;;  %vm7486_vm13 = vmmov %vm7443_vm0 }
 0x266   : > { %5178 = vmatmul.mubr.msk.bf16.gmra.mrb[0].mxu1 %vm7472_vm1, %v6374_v38  ;;  %v3744_v38 = vsel %vm6640_vm8, %v3712_v13, 0.0  ;;  %vm7479_vm8 = vmmov %vm7443_vm0 }
 0x267   : > { %5181 = vmatprep.mubr.msk.bf16.mxu1 %vm7473_vm2, %v6377_v60  ;;  %vm7487_vm1 = vmmov %vm7443_vm0 }
 0x268   : > { %vm7488_vm2 = vmmov %vm7443_vm0 }
 0x26e   : > { %5182 = vmatmul.mubr.msk.bf16.gmra.mrb[4].mxu1 %vm7474_vm3, %v6380_v54  ;;  %v3760_v54 = vpack.c.bf16 %v3744_v38, %v3711_v49  ;;  %vm7489_vm3 = vmmov %vm7443_vm0 }
 0x26f   : > { %5185 = vmatprep.mubr.msk.bf16.mxu1 %vm7475_vm9, %v6383_v30  ;;  %vm7490_vm9 = vmmov %vm7443_vm0 }
 0x276   : > { %5186 = vmatmul.mubr.msk.bf16.gmra.mrb[8].mxu1 %vm7476_vm5, %v6403_v10  ;;  %v6775_v53 = vpop.f32.mrb[48].mxu0  ;;  %vm7491_vm5 = vmmov %vm7443_vm0 }
 0x277   : > { %5189 = vmatprep.mubr.msk.bf16.mxu1 %vm7477_vm12, %v6406_v31  ;;  %v6777_v60 = vpop.f32.mrb[49].mxu0  ;;  %vm7492_vm12 = vmmov %vm7443_vm0 }
 0x278   : > { %v6779_v22 = vpop.f32.mrb[50].mxu0 }
 0x279   : > { %v6781_v16 = vpop.f32.mrb[51].mxu0 }
 0x27e   : > { %5190 = vmatmul.mubr.msk.bf16.gmra.mrb[12].mxu1 %vm7478_vm4, %v3760_v54  ;;  %v6784_v30 = vpop.f32.mrb[52].mxu0  ;;  %vm7493_vm4 = vmmov %vm7443_vm0 }
 0x27f   : > { %v6786_v10 = vpop.f32.mrb[53].mxu0 }
 0x280   : > { %v6788_v31 = vpop.f32.mrb[54].mxu0 }
 0x281   : > { %v6790_v1 = vpop.f32.mrb[55].mxu0 }
 0x286   : > { %v6792_v37 = vpop.f32.mrb[56].mxu0 }
 0x287   : > { %v6794_v15 = vpop.f32.mrb[57].mxu0 }
 0x288   : > { %v6796_v17 = vpop.f32.mrb[58].mxu0 }
 0x289   : > { %v6798_v61 = vpop.f32.mrb[59].mxu0 }
 0x28e   : > { %v6800_v34 = vpop.f32.mrb[60].mxu0 }
 0x28f   : > { %v6802_v39 = vpop.f32.mrb[61].mxu0 }
 0x290   : > { %v6804_v40 = vpop.f32.mrb[62].mxu0 }
 0x291   : > { %v6806_v23 = vpop.f32.mrb[63].mxu0 }
 0x296   : > { %v4993_v20 = vpop.f32.mrb[32].mxu0 }
 0x297   : > { %v2282_v25 = vpop.f32.mrb[33].mxu0 }
 0x298   : > { %v4994_v11 = vpop.f32.mrb[34].mxu0 }
 0x299   : > { %v2285_v52 = vpop.f32.mrb[35].mxu0 }
 0x29e   : > { %v4997_v3 = vpop.f32.mrb[36].mxu0 }
 0x29f   : > { %v2298_v59 = vpop.f32.mrb[37].mxu0 }
 0x2a0   : > { %v4998_v26 = vpop.f32.mrb[38].mxu0 }
 0x2a1   : > { %v2301_v48 = vpop.f32.mrb[39].mxu0 }
 0x2a6   : > { %v5001_v32 = vpop.f32.mrb[40].mxu0 }
 0x2a7   : > { %v2314_v43 = vpop.f32.mrb[41].mxu0 }
 0x2a8   : > { %v5002_v44 = vpop.f32.mrb[42].mxu0 }
 0x2a9   : > { %v2317_v41 = vpop.f32.mrb[43].mxu0 }
 0x2ae   : > { %v6808_v47 = vpop.f32.mrb[44].mxu0 }
 0x2af   : > { %v6810_v24 = vpop.f32.mrb[45].mxu0 }
 0x2b0   : > { %v6812_v36 = vpop.f32.mrb[46].mxu0 }
 0x2b1   : > { %v6814_v51 = vpop.f32.mrb[47].mxu0 }
 0x319   : > { %v5163_v63 = vpop.f32.mrb[16].mxu1 }
 0x31a   : > { %v5229_v8 = vadd.f32 %v5163_v63, %v4993_v20  ;;  %v3848_v12 = vpop.f32.mrb[17].mxu1 }
 0x31b   : > { %v5230_v33 = vadd.f32 %v3848_v12, %v2282_v25  ;;  %v5164_v9 = vpop.f32.mrb[18].mxu1 }
 0x31c   : > { %v4016_v5 = vadd.f32 %v5229_v8, %v6819_v55  ;;  %v5231_v46 = vadd.f32 %v5164_v9, %v4994_v11  ;;  %v3851_v42 = vpop.f32.mrb[19].mxu1 }
 0x31d   : > { %v4014_v14 = vadd.f32 %v5230_v33, %v6819_v55  ;;  %v5232_v58 = vadd.f32 %v3851_v42, %v2285_v52 }
 0x31e   : > { %v4017_v57 = vadd.f32 %v5231_v46, %v6819_v55  ;;  %v4048_v18 = vmax.f32 %v4016_v5, 0.0 }
 0x31f   : > { %v4015_v0 = vadd.f32 %v5232_v58, %v6819_v55  ;;  %v4046_v19 = vmax.f32 %v4014_v14, 0.0 }
 0x320   : > { %v4049_v29 = vmax.f32 %v4017_v57, 0.0 }
 0x321   : > { %v4047_v62 = vmax.f32 %v4015_v0, 0.0  ;;  %v5167_v56 = vpop.f32.mrb[20].mxu1 }
 0x322   : > { %v4079_v21 = vpack.c.bf16 %v4049_v29, %v4048_v18  ;;  %v5233_v27 = vadd.f32 %v5167_v56, %v4997_v3  ;;  %v3864_v2 = vpop.f32.mrb[21].mxu1 }
 0x323   : > { %v4078_v35 = vpack.c.bf16 %v4047_v62, %v4046_v19  ;;  %v5234_v28 = vadd.f32 %v3864_v2, %v2298_v59  ;;  %v5168_v4 = vpop.f32.mrb[22].mxu1 }
 0x324   : > { %v4020_v45 = vadd.f32 %v5233_v27, %v6819_v55  ;;  %v5235_v6 = vadd.f32 %v5168_v4, %v4998_v26  ;;  %v3867_v50 = vpop.f32.mrb[23].mxu1 }
 0x325   : > { %v4018_v7 = vadd.f32 %v5234_v28, %v6819_v55  ;;  %v5236_v13 = vadd.f32 %v3867_v50, %v2301_v48  ;;  %5195 = vmatprep.mubr.msk.bf16.mxu0 %vm7479_vm8, %v4078_v35  ;;  %vm7494_vm8 = vcmask 130048  }
 0x326   : > { %v4021_v49 = vadd.f32 %v5235_v6, %v6819_v55  ;;  %5196 = vmatmul.mubr.msk.bf16.vlgmr.msra.gmra.mrb[64].mxu0 %vm7480_vm6, %v4079_v21  ;;  %v4052_v54 = vmax.f32 %v4020_v45, 0.0  ;;  %vm7495_vm6 = vmmov %vm7494_vm8 }
 0x327   : > { %v4019_v38 = vadd.f32 %v5236_v13, %v6819_v55  ;;  %v4050_v25 = vmax.f32 %v4018_v7, 0.0 }
 0x328   : > { %v4053_v20 = vmax.f32 %v4021_v49, 0.0 }
 0x329   : > { %v4051_v11 = vmax.f32 %v4019_v38, 0.0  ;;  %v5171_v52 = vpop.f32.mrb[24].mxu1 }
 0x32a   : > { %v4081_v3 = vpack.c.bf16 %v4053_v20, %v4052_v54  ;;  %v5237_v59 = vadd.f32 %v5171_v52, %v5001_v32  ;;  %v3880_v26 = vpop.f32.mrb[25].mxu1 }
 0x32b   : > { %v4080_v63 = vpack.c.bf16 %v4051_v11, %v4050_v25  ;;  %v5238_v8 = vadd.f32 %v3880_v26, %v2314_v43  ;;  %v5172_v12 = vpop.f32.mrb[26].mxu1 }
 0x32c   : > { %v4024_v48 = vadd.f32 %v5237_v59, %v6819_v55  ;;  %v5239_v33 = vadd.f32 %v5172_v12, %v5002_v44  ;;  %v3883_v9 = vpop.f32.mrb[27].mxu1 }
 0x32d   : > { %v4022_v5 = vadd.f32 %v5238_v8, %v6819_v55  ;;  %v5240_v46 = vadd.f32 %v3883_v9, %v2317_v41  ;;  %5199 = vmatprep.mubr.msk.bf16.mxu0 %vm7481_vm14, %v4080_v63  ;;  %vm7496_vm14 = vmmov %vm7495_vm6 }
 0x32e   : > { %v4025_v42 = vadd.f32 %v5239_v33, %v6819_v55  ;;  %5200 = vmatmul.mubr.msk.bf16.gmra.mrb[68].mxu0 %vm7443_vm0, %v4081_v3  ;;  %v4056_v32 = vmax.f32 %v4024_v48, 0.0  ;;  %vm7497_vm0 = vmmov %vm7495_vm6 }
 0x32f   : > { %v4023_v14 = vadd.f32 %v5240_v46, %v6819_v55  ;;  %v4054_v57 = vmax.f32 %v4022_v5, 0.0 }
 0x330   : > { %v4057_v58 = vmax.f32 %v4025_v42, 0.0 }
 0x331   : > { %v4055_v43 = vmax.f32 %v4023_v14, 0.0  ;;  %v5175_v0 = vpop.f32.mrb[28].mxu1 }
 0x332   : > { %v4083_v18 = vpack.c.bf16 %v4057_v58, %v4056_v32  ;;  %v5241_v44 = vadd.f32 %v5175_v0, %v6808_v47  ;;  %v3896_v29 = vpop.f32.mrb[29].mxu1 }
 0x333   : > { %v4082_v19 = vpack.c.bf16 %v4055_v43, %v4054_v57  ;;  %v5242_v41 = vadd.f32 %v3896_v29, %v6810_v24  ;;  %v5176_v62 = vpop.f32.mrb[30].mxu1 }
 0x334   : > { %v4028_v56 = vadd.f32 %v5241_v44, %v6819_v55  ;;  %v5243_v21 = vadd.f32 %v5176_v62, %v6812_v36  ;;  %v3899_v27 = vpop.f32.mrb[31].mxu1 }
 0x335   : > { %v4026_v2 = vadd.f32 %v5242_v41, %v6819_v55  ;;  %v5244_v35 = vadd.f32 %v3899_v27, %v6814_v51  ;;  %5203 = vmatprep.mubr.msk.bf16.mxu0 %vm7482_vm15, %v4082_v19  ;;  %vm7498_vm15 = vmmov %vm7497_vm0 }
 0x336   : > { %v4029_v28 = vadd.f32 %v5243_v21, %v6819_v55  ;;  %5204 = vmatmul.mubr.msk.bf16.gmra.mrb[72].mxu0 %vm7483_vm10, %v4083_v18  ;;  %v4060_v4 = vmax.f32 %v4028_v56, 0.0  ;;  %vm7499_vm10 = vmmov %vm7497_vm0 }
 0x337   : > { %v4027_v47 = vadd.f32 %v5244_v35, %v6819_v55  ;;  %v4058_v45 = vmax.f32 %v4026_v2, 0.0 }
 0x338   : > { %v4061_v24 = vmax.f32 %v4029_v28, 0.0 }
 0x339   : > { %v4059_v6 = vmax.f32 %v4027_v47, 0.0  ;;  %v5179_v50 = vpop.f32.mrb[0].mxu1 }
 0x33a   : > { %v4085_v7 = vpack.c.bf16 %v4061_v24, %v4060_v4  ;;  %v5245_v36 = vadd.f32 %v5179_v50, %v6775_v53  ;;  %v3912_v13 = vpop.f32.mrb[1].mxu1 }
 0x33b   : > { %v4084_v49 = vpack.c.bf16 %v4059_v6, %v4058_v45  ;;  %v5246_v51 = vadd.f32 %v3912_v13, %v6777_v60  ;;  %v5180_v38 = vpop.f32.mrb[2].mxu1 }
 0x33c   : > { %v4032_v54 = vadd.f32 %v5245_v36, %v6819_v55  ;;  %v5247_v20 = vadd.f32 %v5180_v38, %v6779_v22  ;;  %v3915_v25 = vpop.f32.mrb[3].mxu1 }
 0x33d   : > { %v4030_v11 = vadd.f32 %v5246_v51, %v6819_v55  ;;  %v5248_v52 = vadd.f32 %v3915_v25, %v6781_v16  ;;  %5207 = vmatprep.mubr.msk.bf16.mxu0 %vm7484_vm7, %v4084_v49  ;;  %vm7500_vm7 = vmmov %vm7497_vm0 }
 0x33e   : > { %v4033_v3 = vadd.f32 %v5247_v20, %v6819_v55  ;;  %5208 = vmatmul.mubr.msk.bf16.gmra.mrb[76].mxu0 %vm7485_vm11, %v4085_v7  ;;  %v4064_v59 = vmax.f32 %v4032_v54, 0.0  ;;  %vm7501_vm11 = vmmov %vm7497_vm0 }
 0x33f   : > { %v4031_v53 = vadd.f32 %v5248_v52, %v6819_v55  ;;  %v4062_v26 = vmax.f32 %v4030_v11, 0.0 }
 0x340   : > { %v4065_v60 = vmax.f32 %v4033_v3, 0.0 }
 0x341   : > { %v4063_v63 = vmax.f32 %v4031_v53, 0.0  ;;  %v5183_v8 = vpop.f32.mrb[4].mxu1 }
 0x342   : > { %v4087_v12 = vpack.c.bf16 %v4065_v60, %v4064_v59  ;;  %v5249_v22 = vadd.f32 %v5183_v8, %v6784_v30  ;;  %v3928_v48 = vpop.f32.mrb[5].mxu1 }
 0x343   : > { %v4086_v33 = vpack.c.bf16 %v4063_v63, %v4062_v26  ;;  %v5250_v16 = vadd.f32 %v3928_v48, %v6786_v10  ;;  %v5184_v9 = vpop.f32.mrb[6].mxu1  ;;  %v5506_v26 = vld [vmem:[%s5606_s8 + $0x10] sm:$0xff] }
 0x344   : > { %v4036_v5 = vadd.f32 %v5249_v22, %v6819_v55  ;;  %v5251_v46 = vadd.f32 %v5184_v9, %v6788_v31  ;;  %v3931_v42 = vpop.f32.mrb[7].mxu1  ;;  %v5507_v22 = vld [vmem:[%s5606_s8] sm:$0xff]  ;;  %v5508_v9 = vld [vmem:[%s5606_s8 + $0x18] sm:$0xff] }
 0x345   : > { %v4034_v14 = vadd.f32 %v5250_v16, %v6819_v55  ;;  %v5252_v32 = vadd.f32 %v3931_v42, %v6790_v1  ;;  %5211 = vmatprep.mubr.msk.bf16.mxu0 %vm7486_vm13, %v4086_v33  ;;  %v5509_v42 = vld [vmem:[%s5606_s8 + $0x8] sm:$0xff]  ;;  %vm7502_vm13 = vmmov %vm7497_vm0 }
 0x346   : > { %v4037_v58 = vadd.f32 %v5251_v46, %v6819_v55  ;;  %5212 = vmatmul.mubr.msk.bf16.gmra.mrb[80].mxu0 %vm7487_vm1, %v4087_v12  ;;  %v4068_v57 = vmax.f32 %v4036_v5, 0.0  ;;  %vm7503_vm1 = vmmov %vm7497_vm0 }
 0x347   : > { %v4035_v30 = vadd.f32 %v5252_v32, %v6819_v55  ;;  %v4066_v43 = vmax.f32 %v4034_v14, 0.0 }
 0x348   : > { %v4069_v10 = vmax.f32 %v4037_v58, 0.0 }
 0x349   : > { %v4067_v0 = vmax.f32 %v4035_v30, 0.0  ;;  %v5187_v18 = vpop.f32.mrb[8].mxu1 }
 0x34a   : > { %v4089_v44 = vpack.c.bf16 %v4069_v10, %v4068_v57  ;;  %v5253_v31 = vadd.f32 %v5187_v18, %v6792_v37  ;;  %v3944_v29 = vpop.f32.mrb[9].mxu1  ;;  %v5510_v18 = vld [vmem:[%s5606_s8 + $0x30] sm:$0xff] }
 0x34b   : > { %v4088_v19 = vpack.c.bf16 %v4067_v0, %v4066_v43  ;;  %v5254_v1 = vadd.f32 %v3944_v29, %v6794_v15  ;;  %v5188_v41 = vpop.f32.mrb[10].mxu1 }
 0x34c   : > { %v4040_v62 = vadd.f32 %v5253_v31, %v6819_v55  ;;  %v5255_v56 = vadd.f32 %v5188_v41, %v6796_v17  ;;  %v3947_v21 = vpop.f32.mrb[11].mxu1 }
 0x34d   : > { %v4038_v27 = vadd.f32 %v5254_v1, %v6819_v55  ;;  %v5256_v2 = vadd.f32 %v3947_v21, %v6798_v61  ;;  %5215 = vmatprep.mubr.msk.bf16.mxu0 %vm7488_vm2, %v4088_v19  ;;  %v5511_v19 = vld [vmem:[%s5606_s8 + $0x20] sm:$0xff]  ;;  %vm7504_vm2 = vmmov %vm7497_vm0 }
 0x34e   : > { %v4041_v35 = vadd.f32 %v5255_v56, %v6819_v55  ;;  %5216 = vmatmul.mubr.msk.bf16.gmra.mrb[84].mxu0 %vm7489_vm3, %v4089_v44  ;;  %v4072_v28 = vmax.f32 %v4040_v62, 0.0  ;;  %v5512_v56 = vld [vmem:[%s5606_s8 + $0x38] sm:$0xff]  ;;  %vm7505_vm3 = vmmov %vm7497_vm0 }
 0x34f   : > { %v4039_v37 = vadd.f32 %v5256_v2, %v6819_v55  ;;  %v4070_v47 = vmax.f32 %v4038_v27, 0.0  ;;  %v5513_v2 = vld [vmem:[%s5606_s8 + $0x28] sm:$0xff] }
 0x350   : > { %v4073_v15 = vmax.f32 %v4041_v35, 0.0 }
 0x351   : > { %v4071_v4 = vmax.f32 %v4039_v37, 0.0  ;;  %v5191_v24 = vpop.f32.mrb[12].mxu1 }
 0x352   : > { %v4091_v45 = vpack.c.bf16 %v4073_v15, %v4072_v28  ;;  %v5257_v17 = vadd.f32 %v5191_v24, %v6800_v34  ;;  %v3960_v6 = vpop.f32.mrb[13].mxu1 }
 0x353   : > { %v4090_v50 = vpack.c.bf16 %v4071_v4, %v4070_v47  ;;  %v5258_v61 = vadd.f32 %v3960_v6, %v6802_v39  ;;  %v5192_v7 = vpop.f32.mrb[14].mxu1 }
 0x354   : > { %v4044_v36 = vadd.f32 %v5257_v17, %v6819_v55  ;;  %v5259_v13 = vadd.f32 %v5192_v7, %v6804_v40  ;;  %v3963_v49 = vpop.f32.mrb[15].mxu1  ;;  %v5514_v17 = vld [vmem:[%s5606_s8 + $0x50] sm:$0xff]  ;;  %v5515_v7 = vld [vmem:[%s5606_s8 + $0x40] sm:$0xff] }
 0x355   : > { %v4042_v51 = vadd.f32 %v5258_v61, %v6819_v55  ;;  %v5260_v38 = vadd.f32 %v3963_v49, %v6806_v23  ;;  %5219 = vmatprep.mubr.msk.bf16.mxu0 %vm7490_vm9, %v4090_v50  ;;  %v6892_v23 = vld [vmem:[%s7038_s6] ss:$0 sm:$0xff]  ;;  %vm7506_vm9 = vmmov %vm7497_vm0 }
 0x356   : > { %v4045_v54 = vadd.f32 %v5259_v13, %v6819_v55  ;;  %5220 = vmatmul.mubr.msk.bf16.gmra.mrb[88].mxu0 %vm7491_vm5, %v4091_v45  ;;  %v4076_v39 = vmax.f32 %v4044_v36, 0.0  ;;  %vm7507_vm5 = vmmov %vm7497_vm0 }
 0x357   : > { %v4043_v34 = vadd.f32 %v5260_v38, %v6819_v55  ;;  %v4074_v25 = vmax.f32 %v4042_v51, 0.0  ;;  %v5516_v51 = vld [vmem:[%s5606_s8 + $0x58] sm:$0xff] }
 0x358   : > { %v4077_v20 = vmax.f32 %v4045_v54, 0.0 }
 0x359   : > { %v4075_v11 = vmax.f32 %v4043_v34, 0.0  ;;  %v5517_v34 = vld [vmem:[%s5606_s8 + $0x48] sm:$0xff] }
 0x35a   : > { %v4093_v40 = vpack.c.bf16 %v4077_v20, %v4076_v39 }
 0x35b   : > { %v4092_v52 = vpack.c.bf16 %v4075_v11, %v4074_v25 }
 0x35d   : > { %5223 = vmatprep.mubr.msk.bf16.mxu0 %vm7492_vm12, %v4092_v52  ;;  %vm7508_vm12 = vmmov %vm7497_vm0 }
 0x35e   : > { %5224 = vmatmul.mubr.msk.bf16.gmra.mrb[92].mxu0 %vm7493_vm4, %v4093_v40  ;;  %vm7509_vm4 = vmmov %vm7497_vm0 }
 0x3f9   : > { %v5197_v3 = vpop.f32.mrb[64].mxu0 }
 0x3fa   : > { %v4196_v55 = vadd.f32 %v5197_v3, %v6892_v23  ;;  %v4187_v53 = vpop.f32.mrb[65].mxu0 }
 0x3fb   : > { %v4188_v59 = vadd.f32 %v6892_v23, %v4187_v53  ;;  %v5198_v60 = vpop.f32.mrb[66].mxu0  ;;  %v5518_v53 = vld [vmem:[%s5606_s8 + $0x70] sm:$0xff] }
 0x3fc   : > { %v4316_v63 = vadd.f32 %v5506_v26, %v4196_v55  ;;  %v4199_v8 = vadd.f32 %v5198_v60, %v6892_v23  ;;  %v4190_v12 = vpop.f32.mrb[67].mxu0 }
 0x3fd   : > { %v4314_v48 = vadd.f32 %v5507_v22, %v4188_v59  ;;  %v4191_v33 = vadd.f32 %v6892_v23, %v4190_v12 }
 0x3fe   : > { %v4348_v16 = vmax.f32 %v4316_v63, 0.0  ;;  %v4317_v5 = vadd.f32 %v5508_v9, %v4199_v8  ;;  %v5519_v63 = vld [vmem:[%s5606_s8 + $0x60] sm:$0xff]  ;;  %v5521_v9 = vld [vmem:[%s5606_s8 + $0x68] sm:$0xff] }
 0x3ff   : > { %v4346_v46 = vmax.f32 %v4314_v48, 0.0  ;;  %v4315_v14 = vadd.f32 %v5509_v42, %v4191_v33  ;;  %v5520_v48 = vld [vmem:[%s5606_s8 + $0x78] sm:$0xff] }
 0x400   : > { %4380 = vst.msk [vmem:[%s6903_s18 + $0x10] sm:$0xff] %vm7494_vm8, %v4348_v16  ;;  %v4349_v32 = vmax.f32 %v4317_v5, 0.0  ;;  %vm7510_vm8 = vmmov %vm7497_vm0 }
 0x401   : > { %4378 = vst.msk [vmem:[%s6903_s18] sm:$0xff] %vm7495_vm6, %v4346_v46  ;;  %v4347_v58 = vmax.f32 %v4315_v14, 0.0  ;;  %v5201_v30 = vpop.f32.mrb[68].mxu0  ;;  %vm7511_vm6 = vmmov %vm7497_vm0 }
 0x402   : > { %4381 = vst.msk [vmem:[%s6903_s18 + $0x18] sm:$0xff] %vm7496_vm14, %v4349_v32  ;;  %v4212_v57 = vadd.f32 %v5201_v30, %v6892_v23  ;;  %v4203_v10 = vpop.f32.mrb[69].mxu0  ;;  %vm7512_vm14 = vmmov %vm7497_vm0 }
 0x403   : > { %4379 = vst.msk [vmem:[%s6903_s18 + $0x8] sm:$0xff] %vm7497_vm0, %v4347_v58  ;;  %v4204_v43 = vadd.f32 %v6892_v23, %v4203_v10  ;;  %v5202_v0 = vpop.f32.mrb[70].mxu0  ;;  %v5522_v10 = vld [vmem:[%s5606_s8 + $0x90] sm:$0xff] }
 0x404   : > { %v4320_v44 = vadd.f32 %v5510_v18, %v4212_v57  ;;  %v4215_v31 = vadd.f32 %v5202_v0, %v6892_v23  ;;  %v4206_v29 = vpop.f32.mrb[71].mxu0 }
 0x405   : > { %v4318_v1 = vadd.f32 %v5511_v19, %v4204_v43  ;;  %v4207_v41 = vadd.f32 %v6892_v23, %v4206_v29 }
 0x406   : > { %v4352_v62 = vmax.f32 %v4320_v44, 0.0  ;;  %v4321_v21 = vadd.f32 %v5512_v56, %v4215_v31  ;;  %v5523_v44 = vld [vmem:[%s5606_s8 + $0x80] sm:$0xff]  ;;  %v5525_v56 = vld [vmem:[%s5606_s8 + $0x88] sm:$0xff] }
 0x407   : > { %v4350_v27 = vmax.f32 %v4318_v1, 0.0  ;;  %v4319_v35 = vadd.f32 %v5513_v2, %v4207_v41  ;;  %v5524_v1 = vld [vmem:[%s5606_s8 + $0x98] sm:$0xff] }
 0x408   : > { %4384 = vst.msk [vmem:[%s6903_s18 + $0x30] sm:$0xff] %vm7498_vm15, %v4352_v62  ;;  %v4353_v37 = vmax.f32 %v4321_v21, 0.0  ;;  %vm7513_vm15 = vmmov %vm7497_vm0 }
 0x409   : > { %4382 = vst.msk [vmem:[%s6903_s18 + $0x20] sm:$0xff] %vm7499_vm10, %v4350_v27  ;;  %v4351_v28 = vmax.f32 %v4319_v35, 0.0  ;;  %v5205_v15 = vpop.f32.mrb[72].mxu0  ;;  %vm7514_vm10 = vmmov %vm7497_vm0 }
 0x40a   : > { %4385 = vst.msk [vmem:[%s6903_s18 + $0x38] sm:$0xff] %vm7500_vm7, %v4353_v37  ;;  %v4228_v47 = vadd.f32 %v5205_v15, %v6892_v23  ;;  %v4219_v4 = vpop.f32.mrb[73].mxu0  ;;  %vm7515_vm7 = vmmov %vm7497_vm0 }
 0x40b   : > { %4383 = vst.msk [vmem:[%s6903_s18 + $0x28] sm:$0xff] %vm7501_vm11, %v4351_v28  ;;  %v4220_v24 = vadd.f32 %v6892_v23, %v4219_v4  ;;  %v5206_v45 = vpop.f32.mrb[74].mxu0  ;;  %v5526_v4 = vld [vmem:[%s5606_s8 + $0xb0] sm:$0xff]  ;;  %vm7516_vm11 = vmmov %vm7497_vm0 }
 0x40c   : > { %v4324_v6 = vadd.f32 %v5514_v17, %v4228_v47  ;;  %v4231_v50 = vadd.f32 %v5206_v45, %v6892_v23  ;;  %v4222_v61 = vpop.f32.mrb[75].mxu0 }
 0x40d   : > { %v4322_v36 = vadd.f32 %v5515_v7, %v4220_v24  ;;  %v4223_v13 = vadd.f32 %v6892_v23, %v4222_v61 }
 0x40e   : > { %v4356_v49 = vmax.f32 %v4324_v6, 0.0  ;;  %v4325_v38 = vadd.f32 %v5516_v51, %v4231_v50  ;;  %v5527_v6 = vld [vmem:[%s5606_s8 + $0xa0] sm:$0xff]  ;;  %v5529_v51 = vld [vmem:[%s5606_s8 + $0xa8] sm:$0xff] }
 0x40f   : > { %v4354_v54 = vmax.f32 %v4322_v36, 0.0  ;;  %v4323_v39 = vadd.f32 %v5517_v34, %v4223_v13  ;;  %v5528_v36 = vld [vmem:[%s5606_s8 + $0xb8] sm:$0xff] }
 0x410   : > { %4388 = vst.msk [vmem:[%s6903_s18 + $0x50] sm:$0xff] %vm7502_vm13, %v4356_v49  ;;  %v4357_v20 = vmax.f32 %v4325_v38, 0.0  ;;  %vm7517_vm13 = vmmov %vm7497_vm0 }
 0x411   : > { %4386 = vst.msk [vmem:[%s6903_s18 + $0x40] sm:$0xff] %vm7503_vm1, %v4354_v54  ;;  %v4355_v25 = vmax.f32 %v4323_v39, 0.0  ;;  %v5209_v11 = vpop.f32.mrb[76].mxu0  ;;  %vm7518_vm1 = vmmov %vm7497_vm0 }
 0x412   : > { %4389 = vst.msk [vmem:[%s6903_s18 + $0x58] sm:$0xff] %vm7504_vm2, %v4357_v20  ;;  %v4244_v40 = vadd.f32 %v5209_v11, %v6892_v23  ;;  %v4235_v52 = vpop.f32.mrb[77].mxu0  ;;  %vm7519_vm2 = vmmov %vm7497_vm0 }
 0x413   : > { %4387 = vst.msk [vmem:[%s6903_s18 + $0x48] sm:$0xff] %vm7505_vm3, %v4355_v25  ;;  %v4236_v3 = vadd.f32 %v6892_v23, %v4235_v52  ;;  %v5210_v55 = vpop.f32.mrb[78].mxu0  ;;  %v5530_v52 = vld [vmem:[%s5606_s8 + $0xd0] sm:$0xff]  ;;  %vm7520_vm3 = vmmov %vm7497_vm0 }
 0x414   : > { %v4328_v59 = vadd.f32 %v5518_v53, %v4244_v40  ;;  %v4247_v60 = vadd.f32 %v5210_v55, %v6892_v23  ;;  %v4238_v26 = vpop.f32.mrb[79].mxu0 }
 0x415   : > { %v4326_v8 = vadd.f32 %v5519_v63, %v4236_v3  ;;  %v4239_v12 = vadd.f32 %v6892_v23, %v4238_v26 }
 0x416   : > { %v4360_v22 = vmax.f32 %v4328_v59, 0.0  ;;  %v4329_v33 = vadd.f32 %v5520_v48, %v4247_v60  ;;  %v5531_v59 = vld [vmem:[%s5606_s8 + $0xc0] sm:$0xff]  ;;  %v5533_v48 = vld [vmem:[%s5606_s8 + $0xc8] sm:$0xff] }
 0x417   : > { %v4358_v16 = vmax.f32 %v4326_v8, 0.0  ;;  %v4327_v5 = vadd.f32 %v5521_v9, %v4239_v12  ;;  %v5532_v8 = vld [vmem:[%s5606_s8 + $0xd8] sm:$0xff] }
 0x418   : > { %4392 = vst.msk [vmem:[%s6903_s18 + $0x70] sm:$0xff] %vm7506_vm9, %v4360_v22  ;;  %v4361_v46 = vmax.f32 %v4329_v33, 0.0  ;;  %vm7521_vm9 = vmmov %vm7497_vm0 }
 0x419   : > { %4390 = vst.msk [vmem:[%s6903_s18 + $0x60] sm:$0xff] %vm7507_vm5, %v4358_v16  ;;  %v4359_v42 = vmax.f32 %v4327_v5, 0.0  ;;  %v5213_v14 = vpop.f32.mrb[80].mxu0  ;;  %vm7522_vm5 = vmmov %vm7497_vm0 }
 0x41a   : > { %4393 = vst.msk [vmem:[%s6903_s18 + $0x78] sm:$0xff] %vm7508_vm12, %v4361_v46  ;;  %v4260_v32 = vadd.f32 %v5213_v14, %v6892_v23  ;;  %v4251_v58 = vpop.f32.mrb[81].mxu0  ;;  %vm7523_vm12 = vmmov %vm7497_vm0 }
 0x41b   : > { %4391 = vst.msk [vmem:[%s6903_s18 + $0x68] sm:$0xff] %vm7509_vm4, %v4359_v42  ;;  %v4252_v30 = vadd.f32 %v6892_v23, %v4251_v58  ;;  %v5214_v57 = vpop.f32.mrb[82].mxu0  ;;  %v5534_v58 = vld [vmem:[%s5606_s8 + $0xf0] sm:$0xff]  ;;  %vm7524_vm4 = vmmov %vm7497_vm0 }
 0x41c   : > { %v4332_v43 = vadd.f32 %v5522_v10, %v4260_v32  ;;  %v4263_v0 = vadd.f32 %v5214_v57, %v6892_v23  ;;  %v4254_v18 = vpop.f32.mrb[83].mxu0 }
 0x41d   : > { %v4330_v31 = vadd.f32 %v5523_v44, %v4252_v30  ;;  %v4255_v29 = vadd.f32 %v6892_v23, %v4254_v18 }
 0x41e   : > { %v4364_v19 = vmax.f32 %v4332_v43, 0.0  ;;  %v4333_v41 = vadd.f32 %v5524_v1, %v4263_v0  ;;  %v5535_v43 = vld [vmem:[%s5606_s8 + $0xe0] sm:$0xff]  ;;  %v5537_v1 = vld [vmem:[%s5606_s8 + $0xe8] sm:$0xff] }
 0x41f   : > { %v4362_v62 = vmax.f32 %v4330_v31, 0.0  ;;  %v4331_v21 = vadd.f32 %v5525_v56, %v4255_v29  ;;  %v5536_v31 = vld [vmem:[%s5606_s8 + $0xf8] sm:$0xff] }
 0x420   : > { %4396 = vst.msk [vmem:[%s6903_s18 + $0x90] sm:$0xff] %vm7510_vm8, %v4364_v19  ;;  %v4365_v27 = vmax.f32 %v4333_v41, 0.0 }
 0x421   : > { %4394 = vst.msk [vmem:[%s6903_s18 + $0x80] sm:$0xff] %vm7511_vm6, %v4362_v62  ;;  %v4363_v2 = vmax.f32 %v4331_v21, 0.0  ;;  %v5217_v35 = vpop.f32.mrb[84].mxu0 }
 0x422   : > { %4397 = vst.msk [vmem:[%s6903_s18 + $0x98] sm:$0xff] %vm7512_vm14, %v4365_v27  ;;  %v4276_v37 = vadd.f32 %v5217_v35, %v6892_v23  ;;  %v4267_v28 = vpop.f32.mrb[85].mxu0 }
 0x423   : > { %4395 = vst.msk [vmem:[%s6903_s18 + $0x88] sm:$0xff] %vm7497_vm0, %v4363_v2  ;;  %v4268_v15 = vadd.f32 %v6892_v23, %v4267_v28  ;;  %v5218_v47 = vpop.f32.mrb[86].mxu0 }
 0x424   : > { %v4336_v24 = vadd.f32 %v5526_v4, %v4276_v37  ;;  %v4279_v45 = vadd.f32 %v5218_v47, %v6892_v23  ;;  %v4270_v17 = vpop.f32.mrb[87].mxu0 }
 0x425   : > { %v4334_v50 = vadd.f32 %v5527_v6, %v4268_v15  ;;  %v4271_v61 = vadd.f32 %v6892_v23, %v4270_v17 }
 0x426   : > { %v4368_v7 = vmax.f32 %v4336_v24, 0.0  ;;  %v4337_v13 = vadd.f32 %v5528_v36, %v4279_v45 }
 0x427   : > { %v4366_v49 = vmax.f32 %v4334_v50, 0.0  ;;  %v4335_v38 = vadd.f32 %v5529_v51, %v4271_v61 }
 0x428   : > { %4400 = vst.msk [vmem:[%s6903_s18 + $0xb0] sm:$0xff] %vm7513_vm15, %v4368_v7  ;;  %v4369_v54 = vmax.f32 %v4337_v13, 0.0 }
 0x429   : > { %4398 = vst.msk [vmem:[%s6903_s18 + $0xa0] sm:$0xff] %vm7514_vm10, %v4366_v49  ;;  %v4367_v34 = vmax.f32 %v4335_v38, 0.0  ;;  %v5221_v39 = vpop.f32.mrb[88].mxu0 }
 0x42a   : > { %4401 = vst.msk [vmem:[%s6903_s18 + $0xb8] sm:$0xff] %vm7515_vm7, %v4369_v54  ;;  %v4292_v20 = vadd.f32 %v5221_v39, %v6892_v23  ;;  %v4283_v25 = vpop.f32.mrb[89].mxu0 }
 0x42b   : > { %4399 = vst.msk [vmem:[%s6903_s18 + $0xa8] sm:$0xff] %vm7516_vm11, %v4367_v34  ;;  %v4284_v11 = vadd.f32 %v6892_v23, %v4283_v25  ;;  %v5222_v40 = vpop.f32.mrb[90].mxu0 }
 0x42c   : > { %v4340_v3 = vadd.f32 %v5530_v52, %v4292_v20  ;;  %v4295_v55 = vadd.f32 %v5222_v40, %v6892_v23  ;;  %v4286_v53 = vpop.f32.mrb[91].mxu0 }
 0x42d   : > { %v4338_v60 = vadd.f32 %v5531_v59, %v4284_v11  ;;  %v4287_v26 = vadd.f32 %v6892_v23, %v4286_v53 }
 0x42e   : > { %v4372_v63 = vmax.f32 %v4340_v3, 0.0  ;;  %v4341_v12 = vadd.f32 %v5532_v8, %v4295_v55 }
 0x42f   : > { %v4370_v22 = vmax.f32 %v4338_v60, 0.0  ;;  %v4339_v33 = vadd.f32 %v5533_v48, %v4287_v26 }
 0x430   : > { %4404 = vst.msk [vmem:[%s6903_s18 + $0xd0] sm:$0xff] %vm7517_vm13, %v4372_v63  ;;  %v4373_v16 = vmax.f32 %v4341_v12, 0.0 }
 0x431   : > { %4402 = vst.msk [vmem:[%s6903_s18 + $0xc0] sm:$0xff] %vm7518_vm1, %v4370_v22  ;;  %v4371_v9 = vmax.f32 %v4339_v33, 0.0  ;;  %v5225_v5 = vpop.f32.mrb[92].mxu0 }
 0x432   : > { %4405 = vst.msk [vmem:[%s6903_s18 + $0xd8] sm:$0xff] %vm7519_vm2, %v4373_v16  ;;  %v4308_v46 = vadd.f32 %v5225_v5, %v6892_v23  ;;  %v4299_v42 = vpop.f32.mrb[93].mxu0 }
 0x433   : > { %4403 = vst.msk [vmem:[%s6903_s18 + $0xc8] sm:$0xff] %vm7520_vm3, %v4371_v9  ;;  %v4300_v14 = vadd.f32 %v6892_v23, %v4299_v42  ;;  %v5226_v32 = vpop.f32.mrb[94].mxu0 }
 0x434   : > { %v4344_v30 = vadd.f32 %v5534_v58, %v4308_v46  ;;  %v4311_v57 = vadd.f32 %v5226_v32, %v6892_v23  ;;  %v4302_v10 = vpop.f32.mrb[95].mxu0 }
 0x435   : > { %v4342_v0 = vadd.f32 %v5535_v43, %v4300_v14  ;;  %v4303_v18 = vadd.f32 %v6892_v23, %v4302_v10 }
 0x436   : > { %v4376_v44 = vmax.f32 %v4344_v30, 0.0  ;;  %v4345_v29 = vadd.f32 %v5536_v31, %v4311_v57 }
 0x437   : > { %v4374_v19 = vmax.f32 %v4342_v0, 0.0  ;;  %v4343_v41 = vadd.f32 %v5537_v1, %v4303_v18 }
 0x438   : > { %4408 = vst.msk [vmem:[%s6903_s18 + $0xf0] sm:$0xff] %vm7521_vm9, %v4376_v44  ;;  %v4377_v62 = vmax.f32 %v4345_v29, 0.0 }
 0x439   : > { %4406 = vst.msk [vmem:[%s6903_s18 + $0xe0] sm:$0xff] %vm7522_vm5, %v4374_v19  ;;  %v4375_v56 = vmax.f32 %v4343_v41, 0.0 }
 0x43a   : > { %4409 = vst.msk [vmem:[%s6903_s18 + $0xf8] sm:$0xff] %vm7523_vm12, %v4377_v62 }
 0x43b   : > { %4407 = vst.msk [vmem:[%s6903_s18 + $0xe8] sm:$0xff] %vm7524_vm4, %v4375_v56 }
 0x43c PF: > { %s17_s24 = sadd.s32 1, %s5544_s24  }
 0x43d   : > { %p14_p4 = scmp.ge.s32.totalorder %s17_s24, 4  }
 0x43f   :  { %16 = sbr.rel (!%p14_p4) target bundleno = 1 (0x1), region = 86 }

</bundles_post_ra>
